<compile_context>
chip_gen: v6e
topology: v6e:2x2x1
jax: 0.10.0
libtpu: 0.0.40
codegen_flags: <defaults>
</compile_context>

<pallas_src>
import functools

import jax
import jax.numpy as jnp
from jax.experimental import pallas as pl
from jax.experimental.pallas import tpu as pltpu

# ---------------- MANO-sized constants ----------------
V = 778                     # MANO vertex count
NJ = 16                     # articulated joints (global + 15)
NJ_OUT = 21                 # output joints
NCOMPS = 15                 # PCA components
NBETAS = 10                 # shape betas
NPOSE_FEAT = (NJ - 1) * 9   # 135 pose-blendshape features
K = NBETAS + NPOSE_FEAT     # 145 blend-shape features (template handled separately)

# TPU-friendly padded sizes
VP = 896                    # 7 * 128 vertex lanes
KP = 160                    # feature rows padded to a multiple of 16 (bf16 packing)
JP = 128                    # padded output-joint lanes

# Batch-tile cap: keeps the per-step working set (~5-6 MiB double-buffered)
# under every generation's scoped-VMEM default.  Raise to 256 on v6e/v7x; if
# pushed beyond ~384 on v5e, also raise vmem_limit_bytes in CompilerParams.
BT_CAP = 128

PARENTS = (-1, 0, 1, 2, 0, 4, 5, 0, 7, 8, 0, 10, 11, 0, 13, 14)


def _round_up(x, m):
    return ((x + m - 1) // m) * m


def _choose_bt(B):
    b8 = _round_up(B, 8)
    return b8 if b8 <= BT_CAP else BT_CAP


# ---------------- Pallas kernel ----------------
def _mano_kernel(feat_ref, dirs_ref, tmpl_ref, arot_ref, atrn_ref,
                 wTbf_ref, wTf_ref, jregT_ref, verts_ref, joints_ref):
    bt = feat_ref.shape[0]

    # 1) blend-shape deltas (shape + pose): one bf16 MXU dot, f32 accumulation.
    #    Coordinate c lives in lanes [c*VP, (c+1)*VP) (896 = 7*128 -> aligned).
    #    The f32 template is added separately so the dominant vertex term keeps
    #    full precision.
    v_all = jnp.dot(feat_ref[...], dirs_ref[...],
                    preferred_element_type=jnp.float32)            # (bt, 3*VP)
    v_posed = [v_all[:, c * VP:(c + 1) * VP] + tmpl_ref[c:c + 1, :]  # (bt, VP)
               for c in range(3)]

    # 2) per-vertex LBS transform entries.  The global affine is already folded
    #    into A on the host.  Rotation entries (the dominant shallow-K dot) run
    #    in bf16; translation entries stay f32 for precision.  f32 accumulation
    #    on both.  The reshapes collapse leading dims of f32 blocks only
    #    (sublane-aligned since bt is a multiple of 8).
    a_rot = arot_ref[...].reshape(9 * bt, NJ).astype(jnp.bfloat16)  # (9*bt, 16)
    Trot = jnp.dot(a_rot, wTbf_ref[...],
                   preferred_element_type=jnp.float32)              # (9*bt, VP)
    a_trn = atrn_ref[...].reshape(3 * bt, NJ)                       # (3*bt, 16) f32
    Ttrn = jnp.dot(a_trn, wTf_ref[...],
                   preferred_element_type=jnp.float32)              # (3*bt, VP)

    def rot(c, d):                                                   # entry (row c, col d)
        e = 3 * c + d
        return Trot[e * bt:(e + 1) * bt, :]                          # (bt, VP)

    def trn(c):
        return Ttrn[c * bt:(c + 1) * bt, :]                          # (bt, VP)

    # 3) skinning (global affine included): dense (bt, VP) slabs, dense stores.
    skinned = []
    for c in range(3):
        sk = trn(c) + rot(c, 0) * v_posed[0] \
                    + rot(c, 1) * v_posed[1] \
                    + rot(c, 2) * v_posed[2]
        skinned.append(sk)
        verts_ref[c, :, :] = sk                                      # dense (bt, VP) store

    # 4) joint regression: all three coordinates in ONE (3*bt, VP)@(VP, JP)
    #    bf16 dot (f32 acc).  Valid post-affine because Jreg rows sum to 1.
    sk_stack = jnp.concatenate(skinned, axis=0).astype(jnp.bfloat16)  # (3*bt, VP)
    j_all = jnp.dot(sk_stack, jregT_ref[...],
                    preferred_element_type=jnp.float32)               # (3*bt, JP)
    for c in range(3):
        joints_ref[c, :, :] = j_all[c * bt:(c + 1) * bt, :]           # dense (bt, JP) store


def _mano_pallas_call(b_pad, bt):
    grid = (b_pad // bt,)
    return pl.pallas_call(
        _mano_kernel,
        out_shape=(jax.ShapeDtypeStruct((3, b_pad, VP), jnp.float32),
                   jax.ShapeDtypeStruct((3, b_pad, JP), jnp.float32)),
        grid=grid,
        in_specs=[
            pl.BlockSpec((bt, KP), lambda i: (i, 0)),              # feat (bf16)
            pl.BlockSpec((KP, 3 * VP), lambda i: (0, 0)),          # blend dirs (bf16, resident)
            pl.BlockSpec((8, VP), lambda i: (0, 0)),               # template (f32, resident)
            pl.BlockSpec((9, bt, NJ), lambda i: (0, i, 0)),        # A rotation entries (f32)
            pl.BlockSpec((3, bt, NJ), lambda i: (0, i, 0)),        # A translation entries (f32)
            pl.BlockSpec((NJ, VP), lambda i: (0, 0)),              # W^T bf16 (resident)
            pl.BlockSpec((NJ, VP), lambda i: (0, 0)),              # W^T f32 (resident)
            pl.BlockSpec((VP, JP), lambda i: (0, 0)),              # Jreg^T bf16 (resident)
        ],
        out_specs=(
            pl.BlockSpec((3, bt, VP), lambda i: (0, i, 0)),
            pl.BlockSpec((3, bt, JP), lambda i: (0, i, 0)),
        ),
        compiler_params=pltpu.CompilerParams(
            # Batch tiles are independent -> shard across TCs on v7x when the
            # grid has >= 2 steps (automatic for B > BT_CAP).
            dimension_semantics=("parallel",),
            # Working set at BT<=256 stays under the default scoped-VMEM limit;
            # set vmem_limit_bytes here if BT is pushed higher (esp. on v5e).
        ),
    )


# ---------------- plain-JAX glue ----------------
def axis_angle_to_matrix(aa):
    # aa: (..., 3) -> (..., 3, 3), Rodrigues formula
    angle = jnp.sqrt(jnp.sum(aa * aa, axis=-1) + 1e-12)[..., None]
    axis = aa / angle
    x, y, z = axis[..., 0], axis[..., 1], axis[..., 2]
    c = jnp.cos(angle[..., 0])
    s = jnp.sin(angle[..., 0])
    C = 1.0 - c
    R = jnp.stack([
        jnp.stack([c + x * x * C, x * y * C - z * s, x * z * C + y * s], axis=-1),
        jnp.stack([y * x * C + z * s, c + y * y * C, y * z * C - x * s], axis=-1),
        jnp.stack([z * x * C - y * s, z * y * C + x * s, c + z * z * C], axis=-1),
    ], axis=-2)
    return R


def rot6d_to_matrix(d6, eps=1e-8):
    # Zhou et al. 6D rotation representation (rows are the basis vectors).
    a1, a2 = d6[..., :3], d6[..., 3:]
    b1 = a1 / (jnp.linalg.norm(a1, axis=-1, keepdims=True) + eps)
    a2p = a2 - jnp.sum(b1 * a2, axis=-1, keepdims=True) * b1
    b2 = a2p / (jnp.linalg.norm(a2p, axis=-1, keepdims=True) + eps)
    b3 = jnp.cross(b1, b2)
    return jnp.stack([b1, b2, b3], axis=-2)


def lbs_transforms(rotmats, j_rest):
    # rotmats: (B,16,3,3); j_rest: (B,16,3) -> rest-removed global transforms (B,16,4,4)
    B = rotmats.shape[0]

    def make_T(R, t):
        top = jnp.concatenate([R, t[:, :, None]], axis=-1)            # (B,3,4)
        bot = jnp.broadcast_to(jnp.array([0., 0., 0., 1.], jnp.float32), (B, 1, 4))
        return jnp.concatenate([top, bot], axis=-2)                   # (B,4,4)

    G = [None] * NJ
    G[0] = make_T(rotmats[:, 0], j_rest[:, 0])
    for k in range(1, NJ):
        p = PARENTS[k]
        local = make_T(rotmats[:, k], j_rest[:, k] - j_rest[:, p])
        G[k] = jnp.einsum('bij,bjk->bik', G[p], local)
    G = jnp.stack(G, axis=1)                                          # (B,16,4,4)
    corr = jnp.einsum('bkij,bkj->bki', G[..., :3, :3], j_rest)        # (B,16,3)
    A = G.at[..., :3, 3].add(-corr)
    return A


def init_mano_params(seed=42):
    keys = jax.random.split(jax.random.PRNGKey(seed), 8)
    return dict(
        v_template=0.1 * jax.random.normal(keys[0], (V, 3), jnp.float32),
        shapedirs=0.01 * jax.random.normal(keys[1], (V, 3, NBETAS), jnp.float32),
        posedirs=0.01 * jax.random.normal(keys[2], (V, 3, NPOSE_FEAT), jnp.float32),
        # Softmax rows sum to 1: required for (a) applying the global affine
        # after joint regression and (b) folding the affine into A before LBS.
        J_reg_rest=jax.nn.softmax(jax.random.normal(keys[3], (NJ, V), jnp.float32), axis=-1),
        J_reg_out=jax.nn.softmax(jax.random.normal(keys[4], (NJ_OUT, V), jnp.float32), axis=-1),
        weights=jax.nn.softmax(2.0 * jax.random.normal(keys[5], (V, NJ), jnp.float32), axis=-1),
        hand_mean=0.1 * jax.random.normal(keys[6], (NPOSE_FEAT // 3,), jnp.float32),  # (45,)
        pca_comps=0.1 * jax.random.normal(keys[7], (NCOMPS, NPOSE_FEAT // 3), jnp.float32),
    )


def pack_static_operands(params):
    """Pack / pad the static MANO operands ONCE (cache across forward calls)."""
    # Blend-shape deltas only (no template, no constant column): bf16 MXU operand.
    dirs_full = jnp.concatenate([
        jnp.transpose(params['shapedirs'], (2, 0, 1)),      # (10, V, 3)
        jnp.transpose(params['posedirs'], (2, 0, 1)),       # (135, V, 3)
    ], axis=0)                                              # (145, V, 3)
    dirs_pad = jnp.zeros((KP, VP, 3), jnp.float32).at[:K, :V, :].set(dirs_full)
    # coordinate-blocked lanes: cols [c*VP,(c+1)*VP) == coordinate c
    dirs_arr = jnp.transpose(dirs_pad, (0, 2, 1)).reshape(KP, 3 * VP).astype(jnp.bfloat16)

    # Template kept separate in f32 (dominant vertex term stays full precision).
    tmpl = jnp.zeros((8, VP), jnp.float32).at[:3, :V].set(params['v_template'].T)

    wT_f32 = jnp.zeros((NJ, VP), jnp.float32).at[:, :V].set(params['weights'].T)
    wT_bf16 = wT_f32.astype(jnp.bfloat16)
    jregT = jnp.zeros((VP, JP), jnp.float32).at[:V, :NJ_OUT].set(
        params['J_reg_out'].T).astype(jnp.bfloat16)
    return dict(dirs=jax.device_put(dirs_arr),
                tmpl=jax.device_put(tmpl),
                wT_bf16=jax.device_put(wT_bf16),
                wT_f32=jax.device_put(wT_f32),
                jregT=jax.device_put(jregT))


@functools.partial(jax.jit, static_argnames=("for_contactpose", "bt", "coord_major"))
def affine_mano_forward(params, packed, pose, shape, trans, rot_6d,
                        for_contactpose=False, bt=None, coord_major=False):
    """pose: (B, 3+ncomps) [global axis-angle | PCA coeffs], shape: (B, 10),
       trans: (B, 3), rot_6d: (B, 6)  ->  verts (B, 778, 3), joints (B, 21, 3).
       coord_major=True returns (3, B, V)/(3, B, 21) and skips the wrapper
       transpose (saves an HBM round trip on writeback-bound v5e)."""
    B = pose.shape[0]
    bt = _choose_bt(B) if bt is None else bt
    b_pad = _round_up(B, bt)

    global_rot = pose[:, :3]
    coeffs = pose[:, 3:]

    # PCA -> full axis-angle hand pose (flat_hand_mean=False -> mean added)
    hand_aa = params['hand_mean'][None] + coeffs @ params['pca_comps']          # (B, 45)
    full_aa = jnp.concatenate([global_rot, hand_aa], axis=-1).reshape(B, NJ, 3)
    rotmats = axis_angle_to_matrix(full_aa)                                     # (B,16,3,3)
    pose_feat = (rotmats[:, 1:] - jnp.eye(3, dtype=jnp.float32)).reshape(B, NPOSE_FEAT)

    # rest joints from shaped template (tiny) + forward kinematics
    v_shaped = params['v_template'][None] + jnp.einsum('vck,bk->bvc', params['shapedirs'], shape)
    j_rest = jnp.einsum('jv,bvc->bjc', params['J_reg_rest'], v_shaped)          # (B,16,3)
    A = lbs_transforms(rotmats, j_rest)                                         # (B,16,4,4)

    # global rigid transform from 6D rotation, FOLDED into A on the host:
    #   A' = [[R_eff, t],[0,1]] @ A   (valid since skinning weights sum to 1)
    # TODO(synk): exact transform_verts convention (row- vs column-vector, inverse handling)
    # approximated as out = R_eff @ x + t with R_eff = R^T when for_contactpose.
    R = rot6d_to_matrix(rot_6d)
    R_eff = jnp.transpose(R, (0, 2, 1)) if for_contactpose else R
    A_rot = A[:, :, :3, :3]                                                     # (B,16,3,3)
    A_trn = A[:, :, :3, 3]                                                      # (B,16,3)
    Ap_rot = jnp.einsum('bce,bked->bkcd', R_eff, A_rot)
    Ap_trn = jnp.einsum('bce,bke->bkc', R_eff, A_trn) + trans[:, None, :]

    # entry-major layouts: rotation entry er = 3*row+col -> (9,B,16); translation -> (3,B,16)
    a_rot = jnp.transpose(Ap_rot.reshape(B, NJ, 9), (2, 0, 1))
    a_trn = jnp.transpose(Ap_trn, (2, 0, 1))

    # ---- assemble per-call padded kernel operands (batch padded to mult of bt) ----
    feat = jnp.concatenate([shape, pose_feat], axis=-1)                         # (B, 145)
    feat_pad = jnp.zeros((b_pad, KP), jnp.bfloat16).at[:B, :K].set(feat.astype(jnp.bfloat16))
    a_rot_pad = jnp.zeros((9, b_pad, NJ), jnp.float32).at[:, :B, :].set(a_rot)
    a_trn_pad = jnp.zeros((3, b_pad, NJ), jnp.float32).at[:, :B, :].set(a_trn)

    verts_p, joints_p = _mano_pallas_call(b_pad, bt)(
        feat_pad, packed['dirs'], packed['tmpl'], a_rot_pad, a_trn_pad,
        packed['wT_bf16'], packed['wT_f32'], packed['jregT'])

    if coord_major:
        return verts_p[:, :B, :V], joints_p[:, :B, :NJ_OUT]
    verts = jnp.transpose(verts_p[:, :B, :V], (1, 2, 0))          # (B, 778, 3)
    joints = jnp.transpose(joints_p[:, :B, :NJ_OUT], (1, 2, 0))   # (B, 21, 3)
    return verts, joints


# TODO(synk): .faces / .closed_faces / anchor_layer accessors of AffineMANO are
# topology lookups (no compute) and are not part of forward(); not implemented.
# TODO(synk): for_oakink branch (center_idx=9 ManoLayer + translation-only) not implemented.

if __name__ == "__main__":
    key = jax.random.PRNGKey(0)
    kp, ks, kt, kr = jax.random.split(key, 4)
    B = 2
    pose = 0.3 * jax.random.normal(kp, (B, 3 + NCOMPS), jnp.float32)
    shape = 0.5 * jax.random.normal(ks, (B, NBETAS), jnp.float32)
    trans = 0.1 * jax.random.normal(kt, (B, 3), jnp.float32)
    rot_6d = jax.random.normal(kr, (B, 6), jnp.float32)

    params = init_mano_params()
    packed = pack_static_operands(params)   # cached static operands (bf16 dirs etc.)

    verts, joints = affine_mano_forward(params, packed, pose, shape, trans, rot_6d,
                                        for_contactpose=False)
    verts, joints = jax.block_until_ready((verts, joints))

    assert verts.shape == (B, V, 3), verts.shape
    assert joints.shape == (B, NJ_OUT, 3), joints.shape
    assert bool(jnp.all(jnp.isfinite(verts))) and bool(jnp.all(jnp.isfinite(joints)))
    print("KERNEL_OK")
</pallas_src>

<mosaic_0001>
module attributes {stable_mosaic.version = 11 : i64} {
  func.func @_mano_kernel(%arg0: i32, %arg1: memref<8x160xbf16, #tpu.memory_space<vmem>>, %arg2: memref<160x2688xbf16, #tpu.memory_space<vmem>>, %arg3: memref<8x896xf32, #tpu.memory_space<vmem>>, %arg4: memref<9x8x16xf32, #tpu.memory_space<vmem>>, %arg5: memref<3x8x16xf32, #tpu.memory_space<vmem>>, %arg6: memref<16x896xbf16, #tpu.memory_space<vmem>>, %arg7: memref<16x896xf32, #tpu.memory_space<vmem>>, %arg8: memref<896x128xbf16, #tpu.memory_space<vmem>>, %arg9: memref<3x8x896xf32, #tpu.memory_space<vmem>>, %arg10: memref<3x8x128xf32, #tpu.memory_space<vmem>>) attributes {dimension_semantics = [#tpu.dimension_semantics<parallel>], iteration_bounds = array<i64: 1>, scalar_prefetch = 0 : i64, scratch_operands = 0 : i64, tpu.core_type = #tpu.core_type<tc>, window_params = [{transform_indices = @transform_0, window_bounds = array<i64: 8, 160>}, {pipeline_mode = #tpu.pipeline_mode<synchronous>, transform_indices = @transform_1, window_bounds = array<i64: 160, 2688>}, {pipeline_mode = #tpu.pipeline_mode<synchronous>, transform_indices = @transform_2, window_bounds = array<i64: 8, 896>}, {transform_indices = @transform_3, window_bounds = array<i64: 9, 8, 16>}, {transform_indices = @transform_4, window_bounds = array<i64: 3, 8, 16>}, {pipeline_mode = #tpu.pipeline_mode<synchronous>, transform_indices = @transform_5, window_bounds = array<i64: 16, 896>}, {pipeline_mode = #tpu.pipeline_mode<synchronous>, transform_indices = @transform_6, window_bounds = array<i64: 16, 896>}, {pipeline_mode = #tpu.pipeline_mode<synchronous>, transform_indices = @transform_7, window_bounds = array<i64: 896, 128>}, {transform_indices = @transform_8, window_bounds = array<i64: 3, 8, 896>}, {transform_indices = @transform_9, window_bounds = array<i64: 3, 8, 128>}]} {
    %c0 = arith.constant 0 : index
    %c0_0 = arith.constant 0 : index
    %0 = vector.load %arg1[%c0, %c0_0] : memref<8x160xbf16, #tpu.memory_space<vmem>>, vector<8x160xbf16>
    %c0_1 = arith.constant 0 : index
    %c0_2 = arith.constant 0 : index
    %1 = vector.load %arg2[%c0_1, %c0_2] : memref<160x2688xbf16, #tpu.memory_space<vmem>>, vector<160x2688xbf16>
    %cst = arith.constant dense<0.000000e+00> : vector<8x2688xf32>
    %2 = tpu.matmul %0, %1, %cst {dimension_numbers = #tpu.dot_dimension_numbers<[1], [0], [0], [1], [0, 0, 1, 1], [], []>} : vector<8x160xbf16>, vector<160x2688xbf16>, vector<8x2688xf32> -> vector<8x2688xf32>
    %3 = vector.extract_strided_slice %2 {offsets = [0, 0], sizes = [8, 896], strides = [1, 1]} : vector<8x2688xf32> to vector<8x896xf32>
    %c0_3 = arith.constant 0 : index
    %c0_4 = arith.constant 0 : index
    %4 = vector.load %arg3[%c0_3, %c0_4] : memref<8x896xf32, #tpu.memory_space<vmem>>, vector<1x896xf32>
    %5 = vector.broadcast %4 : vector<1x896xf32> to vector<8x896xf32>
    %6 = arith.addf %3, %5 : vector<8x896xf32>
    %7 = vector.extract_strided_slice %2 {offsets = [0, 896], sizes = [8, 896], strides = [1, 1]} : vector<8x2688xf32> to vector<8x896xf32>
    %c1 = arith.constant 1 : index
    %c0_5 = arith.constant 0 : index
    %8 = vector.load %arg3[%c1, %c0_5] : memref<8x896xf32, #tpu.memory_space<vmem>>, vector<1x896xf32>
    %9 = vector.broadcast %8 : vector<1x896xf32> to vector<8x896xf32>
    %10 = arith.addf %7, %9 : vector<8x896xf32>
    %11 = vector.extract_strided_slice %2 {offsets = [0, 1792], sizes = [8, 896], strides = [1, 1]} : vector<8x2688xf32> to vector<8x896xf32>
    %c2 = arith.constant 2 : index
    %c0_6 = arith.constant 0 : index
    %12 = vector.load %arg3[%c2, %c0_6] : memref<8x896xf32, #tpu.memory_space<vmem>>, vector<1x896xf32>
    %13 = vector.broadcast %12 : vector<1x896xf32> to vector<8x896xf32>
    %14 = arith.addf %11, %13 : vector<8x896xf32>
    %c0_7 = arith.constant 0 : index
    %c0_8 = arith.constant 0 : index
    %c0_9 = arith.constant 0 : index
    %15 = vector.load %arg4[%c0_7, %c0_8, %c0_9] : memref<9x8x16xf32, #tpu.memory_space<vmem>>, vector<9x8x16xf32>
    %16 = vector.shape_cast %15 : vector<9x8x16xf32> to vector<72x16xf32>
    %17 = arith.truncf %16 : vector<72x16xf32> to vector<72x16xbf16>
    %c0_10 = arith.constant 0 : index
    %c0_11 = arith.constant 0 : index
    %18 = vector.load %arg6[%c0_10, %c0_11] : memref<16x896xbf16, #tpu.memory_space<vmem>>, vector<16x896xbf16>
    %cst_12 = arith.constant dense<0.000000e+00> : vector<72x896xf32>
    %19 = tpu.matmul %17, %18, %cst_12 {dimension_numbers = #tpu.dot_dimension_numbers<[1], [0], [0], [1], [0, 0, 1, 1], [], []>} : vector<72x16xbf16>, vector<16x896xbf16>, vector<72x896xf32> -> vector<72x896xf32>
    %c0_13 = arith.constant 0 : index
    %c0_14 = arith.constant 0 : index
    %c0_15 = arith.constant 0 : index
    %20 = vector.load %arg5[%c0_13, %c0_14, %c0_15] : memref<3x8x16xf32, #tpu.memory_space<vmem>>, vector<3x8x16xf32>
    %21 = vector.shape_cast %20 : vector<3x8x16xf32> to vector<24x16xf32>
    %c0_16 = arith.constant 0 : index
    %c0_17 = arith.constant 0 : index
    %22 = vector.load %arg7[%c0_16, %c0_17] : memref<16x896xf32, #tpu.memory_space<vmem>>, vector<16x896xf32>
    %cst_18 = arith.constant dense<0.000000e+00> : vector<24x896xf32>
    %23 = tpu.matmul %21, %22, %cst_18 {dimension_numbers = #tpu.dot_dimension_numbers<[1], [0], [0], [1], [0, 0, 1, 1], [], []>} : vector<24x16xf32>, vector<16x896xf32>, vector<24x896xf32> -> vector<24x896xf32>
    %24 = vector.extract_strided_slice %23 {offsets = [0, 0], sizes = [8, 896], strides = [1, 1]} : vector<24x896xf32> to vector<8x896xf32>
    %25 = vector.extract_strided_slice %19 {offsets = [0, 0], sizes = [8, 896], strides = [1, 1]} : vector<72x896xf32> to vector<8x896xf32>
    %26 = arith.mulf %25, %6 : vector<8x896xf32>
    %27 = arith.addf %24, %26 : vector<8x896xf32>
    %28 = vector.extract_strided_slice %19 {offsets = [8, 0], sizes = [8, 896], strides = [1, 1]} : vector<72x896xf32> to vector<8x896xf32>
    %29 = arith.mulf %28, %10 : vector<8x896xf32>
    %30 = arith.addf %27, %29 : vector<8x896xf32>
    %31 = vector.extract_strided_slice %19 {offsets = [16, 0], sizes = [8, 896], strides = [1, 1]} : vector<72x896xf32> to vector<8x896xf32>
    %32 = arith.mulf %31, %14 : vector<8x896xf32>
    %33 = arith.addf %30, %32 : vector<8x896xf32>
    %c0_19 = arith.constant 0 : index
    %c0_20 = arith.constant 0 : index
    %c0_21 = arith.constant 0 : index
    %34 = vector.load %arg9[%c0_19, %c0_20, %c0_21] : memref<3x8x896xf32, #tpu.memory_space<vmem>>, vector<1x8x896xf32>
    %35 = vector.shape_cast %34 : vector<1x8x896xf32> to vector<8x896xf32>
    %36 = vector.shape_cast %33 : vector<8x896xf32> to vector<1x8x896xf32>
    tpu.vector_store %arg9[%c0_19, %c0_20, %c0_21], %36 {strides = array<i32>} : memref<3x8x896xf32, #tpu.memory_space<vmem>>, vector<1x8x896xf32>,
    %37 = vector.extract_strided_slice %23 {offsets = [8, 0], sizes = [8, 896], strides = [1, 1]} : vector<24x896xf32> to vector<8x896xf32>
    %38 = vector.extract_strided_slice %19 {offsets = [24, 0], sizes = [8, 896], strides = [1, 1]} : vector<72x896xf32> to vector<8x896xf32>
    %39 = arith.mulf %38, %6 : vector<8x896xf32>
    %40 = arith.addf %37, %39 : vector<8x896xf32>
    %41 = vector.extract_strided_slice %19 {offsets = [32, 0], sizes = [8, 896], strides = [1, 1]} : vector<72x896xf32> to vector<8x896xf32>
    %42 = arith.mulf %41, %10 : vector<8x896xf32>
    %43 = arith.addf %40, %42 : vector<8x896xf32>
    %44 = vector.extract_strided_slice %19 {offsets = [40, 0], sizes = [8, 896], strides = [1, 1]} : vector<72x896xf32> to vector<8x896xf32>
    %45 = arith.mulf %44, %14 : vector<8x896xf32>
    %46 = arith.addf %43, %45 : vector<8x896xf32>
    %c1_22 = arith.constant 1 : index
    %c0_23 = arith.constant 0 : index
    %c0_24 = arith.constant 0 : index
    %47 = vector.load %arg9[%c1_22, %c0_23, %c0_24] : memref<3x8x896xf32, #tpu.memory_space<vmem>>, vector<1x8x896xf32>
    %48 = vector.shape_cast %47 : vector<1x8x896xf32> to vector<8x896xf32>
    %49 = vector.shape_cast %46 : vector<8x896xf32> to vector<1x8x896xf32>
    tpu.vector_store %arg9[%c1_22, %c0_23, %c0_24], %49 {strides = array<i32>} : memref<3x8x896xf32, #tpu.memory_space<vmem>>, vector<1x8x896xf32>,
    %50 = vector.extract_strided_slice %23 {offsets = [16, 0], sizes = [8, 896], strides = [1, 1]} : vector<24x896xf32> to vector<8x896xf32>
    %51 = vector.extract_strided_slice %19 {offsets = [48, 0], sizes = [8, 896], strides = [1, 1]} : vector<72x896xf32> to vector<8x896xf32>
    %52 = arith.mulf %51, %6 : vector<8x896xf32>
    %53 = arith.addf %50, %52 : vector<8x896xf32>
    %54 = vector.extract_strided_slice %19 {offsets = [56, 0], sizes = [8, 896], strides = [1, 1]} : vector<72x896xf32> to vector<8x896xf32>
    %55 = arith.mulf %54, %10 : vector<8x896xf32>
    %56 = arith.addf %53, %55 : vector<8x896xf32>
    %57 = vector.extract_strided_slice %19 {offsets = [64, 0], sizes = [8, 896], strides = [1, 1]} : vector<72x896xf32> to vector<8x896xf32>
    %58 = arith.mulf %57, %14 : vector<8x896xf32>
    %59 = arith.addf %56, %58 : vector<8x896xf32>
    %c2_25 = arith.constant 2 : index
    %c0_26 = arith.constant 0 : index
    %c0_27 = arith.constant 0 : index
    %60 = vector.load %arg9[%c2_25, %c0_26, %c0_27] : memref<3x8x896xf32, #tpu.memory_space<vmem>>, vector<1x8x896xf32>
    %61 = vector.shape_cast %60 : vector<1x8x896xf32> to vector<8x896xf32>
    %62 = vector.shape_cast %59 : vector<8x896xf32> to vector<1x8x896xf32>
    tpu.vector_store %arg9[%c2_25, %c0_26, %c0_27], %62 {strides = array<i32>} : memref<3x8x896xf32, #tpu.memory_space<vmem>>, vector<1x8x896xf32>,
    %63 = tpu.concatenate %33, %46, %59 in 0 : vector<8x896xf32>, vector<8x896xf32>, vector<8x896xf32> -> vector<24x896xf32>
    %64 = arith.truncf %63 : vector<24x896xf32> to vector<24x896xbf16>
    %c0_28 = arith.constant 0 : index
    %c0_29 = arith.constant 0 : index
    %65 = vector.load %arg8[%c0_28, %c0_29] : memref<896x128xbf16, #tpu.memory_space<vmem>>, vector<896x128xbf16>
    %cst_30 = arith.constant dense<0.000000e+00> : vector<24x128xf32>
    %66 = tpu.matmul %64, %65, %cst_30 {dimension_numbers = #tpu.dot_dimension_numbers<[1], [0], [0], [1], [0, 0, 1, 1], [], []>} : vector<24x896xbf16>, vector<896x128xbf16>, vector<24x128xf32> -> vector<24x128xf32>
    %67 = vector.extract_strided_slice %66 {offsets = [0, 0], sizes = [8, 128], strides = [1, 1]} : vector<24x128xf32> to vector<8x128xf32>
    %c0_31 = arith.constant 0 : index
    %c0_32 = arith.constant 0 : index
    %c0_33 = arith.constant 0 : index
    %68 = vector.load %arg10[%c0_31, %c0_32, %c0_33] : memref<3x8x128xf32, #tpu.memory_space<vmem>>, vector<1x8x128xf32>
    %69 = vector.shape_cast %68 : vector<1x8x128xf32> to vector<8x128xf32>
    %70 = vector.shape_cast %67 : vector<8x128xf32> to vector<1x8x128xf32>
    tpu.vector_store %arg10[%c0_31, %c0_32, %c0_33], %70 {strides = array<i32>} : memref<3x8x128xf32, #tpu.memory_space<vmem>>, vector<1x8x128xf32>,
    %71 = vector.extract_strided_slice %66 {offsets = [8, 0], sizes = [8, 128], strides = [1, 1]} : vector<24x128xf32> to vector<8x128xf32>
    %c1_34 = arith.constant 1 : index
    %c0_35 = arith.constant 0 : index
    %c0_36 = arith.constant 0 : index
    %72 = vector.load %arg10[%c1_34, %c0_35, %c0_36] : memref<3x8x128xf32, #tpu.memory_space<vmem>>, vector<1x8x128xf32>
    %73 = vector.shape_cast %72 : vector<1x8x128xf32> to vector<8x128xf32>
    %74 = vector.shape_cast %71 : vector<8x128xf32> to vector<1x8x128xf32>
    tpu.vector_store %arg10[%c1_34, %c0_35, %c0_36], %74 {strides = array<i32>} : memref<3x8x128xf32, #tpu.memory_space<vmem>>, vector<1x8x128xf32>,
    %75 = vector.extract_strided_slice %66 {offsets = [16, 0], sizes = [8, 128], strides = [1, 1]} : vector<24x128xf32> to vector<8x128xf32>
    %c2_37 = arith.constant 2 : index
    %c0_38 = arith.constant 0 : index
    %c0_39 = arith.constant 0 : index
    %76 = vector.load %arg10[%c2_37, %c0_38, %c0_39] : memref<3x8x128xf32, #tpu.memory_space<vmem>>, vector<1x8x128xf32>
    %77 = vector.shape_cast %76 : vector<1x8x128xf32> to vector<8x128xf32>
    %78 = vector.shape_cast %75 : vector<8x128xf32> to vector<1x8x128xf32>
    tpu.vector_store %arg10[%c2_37, %c0_38, %c0_39], %78 {strides = array<i32>} : memref<3x8x128xf32, #tpu.memory_space<vmem>>, vector<1x8x128xf32>,
    return
  }
  func.func @transform_0(%arg0: i32) -> (i32, i32) {
    %c0_i32 = arith.constant 0 : i32
    %c0_i32_0 = arith.constant 0 : i32
    return %arg0, %c0_i32 : i32, i32
  }
  func.func @transform_1(%arg0: i32) -> (i32, i32) {
    %c0_i32 = arith.constant 0 : i32
    %c0_i32_0 = arith.constant 0 : i32
    %c0_i32_1 = arith.constant 0 : i32
    return %c0_i32, %c0_i32_0 : i32, i32
  }
  func.func @transform_2(%arg0: i32) -> (i32, i32) {
    %c0_i32 = arith.constant 0 : i32
    %c0_i32_0 = arith.constant 0 : i32
    %c0_i32_1 = arith.constant 0 : i32
    return %c0_i32, %c0_i32_0 : i32, i32
  }
  func.func @transform_3(%arg0: i32) -> (i32, i32, i32) {
    %c0_i32 = arith.constant 0 : i32
    %c0_i32_0 = arith.constant 0 : i32
    %c0_i32_1 = arith.constant 0 : i32
    return %c0_i32, %arg0, %c0_i32_0 : i32, i32, i32
  }
  func.func @transform_4(%arg0: i32) -> (i32, i32, i32) {
    %c0_i32 = arith.constant 0 : i32
    %c0_i32_0 = arith.constant 0 : i32
    %c0_i32_1 = arith.constant 0 : i32
    return %c0_i32, %arg0, %c0_i32_0 : i32, i32, i32
  }
  func.func @transform_5(%arg0: i32) -> (i32, i32) {
    %c0_i32 = arith.constant 0 : i32
    %c0_i32_0 = arith.constant 0 : i32
    %c0_i32_1 = arith.constant 0 : i32
    return %c0_i32, %c0_i32_0 : i32, i32
  }
  func.func @transform_6(%arg0: i32) -> (i32, i32) {
    %c0_i32 = arith.constant 0 : i32
    %c0_i32_0 = arith.constant 0 : i32
    %c0_i32_1 = arith.constant 0 : i32
    return %c0_i32, %c0_i32_0 : i32, i32
  }
  func.func @transform_7(%arg0: i32) -> (i32, i32) {
    %c0_i32 = arith.constant 0 : i32
    %c0_i32_0 = arith.constant 0 : i32
    %c0_i32_1 = arith.constant 0 : i32
    return %c0_i32, %c0_i32_0 : i32, i32
  }
  func.func @transform_8(%arg0: i32) -> (i32, i32, i32) {
    %c0_i32 = arith.constant 0 : i32
    %c0_i32_0 = arith.constant 0 : i32
    %c0_i32_1 = arith.constant 0 : i32
    return %c0_i32, %arg0, %c0_i32_0 : i32, i32, i32
  }
  func.func @transform_9(%arg0: i32) -> (i32, i32, i32) {
    %c0_i32 = arith.constant 0 : i32
    %c0_i32_0 = arith.constant 0 : i32
    %c0_i32_1 = arith.constant 0 : i32
    return %c0_i32, %arg0, %c0_i32_0 : i32, i32, i32
  }
}

</mosaic_0001>

<bundles_post_ra>
// kernel: affine_mano_forward.1
= control target key start
LH: loop header
LB: loop body
LE: loop exit
PB: predicated region body
PF: predicated region fallthrough
CT: control target
= control target key end

     0   :  { %vm1319_vm0 = vcmask 261120   ;;  %vm1971_vm1 = vcmask 130048   ;;  %vm4356_vm2 = vmmov 0   ;;  %s5999_s1 = inlined_call_operand.vmem [shape: bf16[160,2688], index: 1, kind: input, shape index: {}]   ;;  %s6000_s0 = inlined_call_operand.vmem [shape: bf16[8,160], index: 0, kind: input, shape index: {}]   ;;  %s6001_s5 = inlined_call_operand.vmem [shape: bf16[16,896], index: 5, kind: input, shape index: {}]   ;;  %s6002_s3 = inlined_call_operand.vmem [shape: f32[9,8,16], index: 3, kind: input, shape index: {}]   ;;  %s6003_s6 = inlined_call_operand.vmem [shape: f32[16,896], index: 6, kind: input, shape index: {}]   ;;  %s6004_s4 = inlined_call_operand.vmem [shape: f32[3,8,16], index: 4, kind: input, shape index: {}]   ;;  %s6005_s7 = inlined_call_operand.vmem [shape: bf16[896,128], index: 7, kind: input, shape index: {}]   ;;  %s6006_s2 = inlined_call_operand.vmem [shape: f32[8,896], index: 2, kind: input, shape index: {}]   ;;  %s6007_s8 = inlined_call_operand.vmem [shape: f32[3,8,896], index: 8, kind: output, shape index: {0}]   ;;  %s6008_s9 = inlined_call_operand.vmem [shape: f32[3,8,128], index: 9, kind: output, shape index: {1}]  }
   0x1   :  { %v3976_v0 = vld [vmem:[%s5999_s1 + $0x49c] ss:$84 sps:$4 sm:$0xff]   ;;  %v3978_v1 = vld [vmem:[%s5999_s1 + $0x4a4] ss:$84 sps:$4 sm:$0xff]   ;;  %v3981_v3 = vld [vmem:[%s5999_s1 + $0x4a0] ss:$84 sps:$4 sm:$0xff]  }
   0x2   :  { %1323 = vmatprep.subr.bf16.mxu0 %v3976_v0  ;;  %v3980_v2 = vld [vmem:[%s5999_s1 + $0x498] ss:$84 sps:$4 sm:$0xff]   ;;  %1364 = vmatprep.subr.bf16.mxu1 %v3978_v1  ;;  %v3982_v4 = vld [vmem:[%s5999_s1 + $0x3f4] ss:$84 sps:$4 sm:$0xff]   ;;  %v3984_v5 = vld [vmem:[%s5999_s1 + $0x3fc] ss:$84 sps:$4 sm:$0xff]  }
   0x3   :  { %1324 = vmatpush1.bf16.msra.mxu0 %v3980_v2  ;;  %1365 = vmatpush1.bf16.msra.mxu1 %v3981_v3  ;;  %v3986_v6 = vld [vmem:[%s5999_s1 + $0x3f0] ss:$84 sps:$4 sm:$0xff]   ;;  %v3987_v7 = vld [vmem:[%s5999_s1 + $0x3f8] ss:$84 sps:$4 sm:$0xff]   ;;  %v3990_v9 = vld [vmem:[%s5999_s1 + $0x354] ss:$84 sps:$4 sm:$0xff]  }
   0x4   :  { %1325 = vmatprep.subr.bf16.mxu0 %v3982_v4  ;;  %1366 = vmatprep.subr.bf16.mxu1 %v3984_v5  ;;  %v3988_v8 = vld [vmem:[%s5999_s1 + $0x34c] ss:$84 sps:$4 sm:$0xff]   ;;  %v3992_v10 = vld [vmem:[%s5999_s1 + $0x348] ss:$84 sps:$4 sm:$0xff]   ;;  %v3993_v11 = vld [vmem:[%s5999_s1 + $0x350] ss:$84 sps:$4 sm:$0xff]  }
   0x5   :  { %v3994_v12 = vld [vmem:[%s5999_s1 + $0x2a4] ss:$84 sps:$4 sm:$0xff]   ;;  %v3996_v13 = vld [vmem:[%s5999_s1 + $0x2ac] ss:$84 sps:$4 sm:$0xff]   ;;  %v3999_v15 = vld [vmem:[%s5999_s1 + $0x2a8] ss:$84 sps:$4 sm:$0xff]  }
   0x6   :  { %v3998_v14 = vld [vmem:[%s5999_s1 + $0x2a0] ss:$84 sps:$4 sm:$0xff]   ;;  %v4000_v16 = vld [vmem:[%s5999_s1 + $0x1fc] ss:$84 sps:$4 sm:$0xff]   ;;  %v4002_v17 = vld [vmem:[%s5999_s1 + $0x204] ss:$84 sps:$4 sm:$0xff]  }
   0x7   :  { %1326 = vmatpush1.bf16.msra.mxu0 %v3986_v6  ;;  %1367 = vmatpush1.bf16.msra.mxu1 %v3987_v7  ;;  %v4004_v18 = vld [vmem:[%s5999_s1 + $0x1f8] ss:$84 sps:$4 sm:$0xff]   ;;  %v4005_v19 = vld [vmem:[%s5999_s1 + $0x200] ss:$84 sps:$4 sm:$0xff]   ;;  %v4008_v21 = vld [vmem:[%s5999_s1 + $0x15c] ss:$84 sps:$4 sm:$0xff]  }
   0x8   :  { %1327 = vmatprep.subr.bf16.mxu0 %v3988_v8  ;;  %1368 = vmatprep.subr.bf16.mxu1 %v3990_v9  ;;  %v4006_v20 = vld [vmem:[%s5999_s1 + $0x154] ss:$84 sps:$4 sm:$0xff]   ;;  %v4010_v22 = vld [vmem:[%s5999_s1 + $0x150] ss:$84 sps:$4 sm:$0xff]   ;;  %v4011_v23 = vld [vmem:[%s5999_s1 + $0x158] ss:$84 sps:$4 sm:$0xff]  }
   0x9   :  { %v4012_v24 = vld [vmem:[%s5999_s1 + $0xac] ss:$84 sps:$4 sm:$0xff]   ;;  %v4014_v25 = vld [vmem:[%s5999_s1 + $0xb4] ss:$84 sps:$4 sm:$0xff]   ;;  %v4017_v27 = vld [vmem:[%s5999_s1 + $0xb0] ss:$84 sps:$4 sm:$0xff]  }
   0xa   :  { %v4016_v26 = vld [vmem:[%s5999_s1 + $0xa8] ss:$84 sps:$4 sm:$0xff]   ;;  %v4018_v28 = vld [vmem:[%s5999_s1 + $0x4] ss:$84 sps:$4 sm:$0xff]   ;;  %v4020_v29 = vld [vmem:[%s5999_s1 + $0xc] ss:$84 sps:$4 sm:$0xff]  }
   0xb   :  { %1328 = vmatpush1.bf16.msra.mxu0 %v3992_v10  ;;  %1369 = vmatpush1.bf16.msra.mxu1 %v3993_v11  ;;  %v32_v30 = vld [vmem:[%s6000_s0] sm:$0xff]  ;;  %v4023_v33 = vld [vmem:[%s5999_s1 + $0x8] ss:$84 sps:$4 sm:$0xff]   ;;  %v4050_v53 = vld [vmem:[%s5999_s1 + $0x358] ss:$84 sps:$4 sm:$0xff]  }
   0xc   :  { %1329 = vmatprep.subr.bf16.mxu0 %v3994_v12  ;;  %1370 = vmatprep.subr.bf16.mxu1 %v3996_v13  ;;  %v4022_v31 = vld [vmem:[%s5999_s1] ss:$84 sps:$4 sm:$0xff]   ;;  %v4503_v32 = vcombine.high %v32_v30, %v32_v30  ;;  %v4028_v36 = vld [vmem:[%s5999_s1 + $0x5e8] ss:$84 sps:$4 sm:$0xff]   ;;  %v4029_v37 = vld [vmem:[%s5999_s1 + $0x5f0] ss:$84 sps:$4 sm:$0xff]   ;;  %v4542_v44 = vcombine.low %v32_v30, %v32_v30 }
   0xd   :  { %v4024_v34 = vld [vmem:[%s5999_s1 + $0x5ec] ss:$84 sps:$4 sm:$0xff]   ;;  %v4026_v35 = vld [vmem:[%s5999_s1 + $0x5f4] ss:$84 sps:$4 sm:$0xff]   ;;  %v4030_v38 = vld [vmem:[%s5999_s1 + $0x544] ss:$84 sps:$4 sm:$0xff]  }
   0xe   :  { %3685 = vmatprep.mubr.msk.bf16.mxu0 %vm1319_vm0, %v4503_v32  ;;  %3686 = vmatprep.mubr.msk.bf16.mxu1 %vm1319_vm0, %v4503_v32  ;;  %v4032_v39 = vld [vmem:[%s5999_s1 + $0x54c] ss:$84 sps:$4 sm:$0xff]   ;;  %v4035_v41 = vld [vmem:[%s5999_s1 + $0x548] ss:$84 sps:$4 sm:$0xff]   ;;  %v4041_v46 = vld [vmem:[%s5999_s1 + $0x4b0] ss:$84 sps:$4 sm:$0xff]  }
   0xf   :  { %1330 = vmatpush1.bf16.msra.mxu0 %v3998_v14  ;;  %1371 = vmatpush1.bf16.msra.mxu1 %v3999_v15  ;;  %v4034_v40 = vld [vmem:[%s5999_s1 + $0x540] ss:$84 sps:$4 sm:$0xff]   ;;  %v4038_v45 = vld [vmem:[%s5999_s1 + $0x4a8] ss:$84 sps:$4 sm:$0xff]   ;;  %v4046_v47 = vld [vmem:[%s5999_s1 + $0x404] ss:$84 sps:$4 sm:$0xff]  }
  0x10   :  { %1331 = vmatprep.subr.bf16.mxu0 %v4000_v16  ;;  %1372 = vmatprep.subr.bf16.mxu1 %v4002_v17  ;;  %v4040_v42 = vld [vmem:[%s5999_s1 + $0x4ac] ss:$84 sps:$4 sm:$0xff]   ;;  %v4043_v43 = vld [vmem:[%s5999_s1 + $0x4b4] ss:$84 sps:$4 sm:$0xff]   ;;  %v4052_v51 = vld [vmem:[%s5999_s1 + $0x35c] ss:$84 sps:$4 sm:$0xff]  }
  0x11   :  { %v4049_v48 = vld [vmem:[%s5999_s1 + $0x40c] ss:$84 sps:$4 sm:$0xff]   ;;  %v4047_v50 = vld [vmem:[%s5999_s1 + $0x408] ss:$84 sps:$4 sm:$0xff]   ;;  %v4055_v52 = vld [vmem:[%s5999_s1 + $0x364] ss:$84 sps:$4 sm:$0xff]  }
  0x12   :  { %v4044_v49 = vld [vmem:[%s5999_s1 + $0x400] ss:$84 sps:$4 sm:$0xff]   ;;  %v4061_v56 = vld [vmem:[%s5999_s1 + $0x2bc] ss:$84 sps:$4 sm:$0xff]   ;;  %v4059_v58 = vld [vmem:[%s5999_s1 + $0x2b8] ss:$84 sps:$4 sm:$0xff]  }
  0x13   :  { %1332 = vmatpush1.bf16.msra.mxu0 %v4004_v18  ;;  %1373 = vmatpush1.bf16.msra.mxu1 %v4005_v19  ;;  %v4053_v54 = vld [vmem:[%s5999_s1 + $0x360] ss:$84 sps:$4 sm:$0xff]   ;;  %v4056_v57 = vld [vmem:[%s5999_s1 + $0x2b0] ss:$84 sps:$4 sm:$0xff]   ;;  %v4062_v61 = vld [vmem:[%s5999_s1 + $0x208] ss:$84 sps:$4 sm:$0xff]  }
  0x14   :  { %1333 = vmatprep.subr.bf16.mxu0 %v4006_v20  ;;  %1374 = vmatprep.subr.bf16.mxu1 %v4008_v21  ;;  %v4058_v55 = vld [vmem:[%s5999_s1 + $0x2b4] ss:$84 sps:$4 sm:$0xff]   ;;  %v4064_v59 = vld [vmem:[%s5999_s1 + $0x20c] ss:$84 sps:$4 sm:$0xff]   ;;  %v4065_v62 = vld [vmem:[%s5999_s1 + $0x210] ss:$84 sps:$4 sm:$0xff]  }
  0x15   :  { %v4067_v60 = vld [vmem:[%s5999_s1 + $0x214] ss:$84 sps:$4 sm:$0xff]   ;;  %v4070_v63 = vld [vmem:[%s5999_s1 + $0x164] ss:$84 sps:$4 sm:$0xff]   ;;  %v4073_v0 = vld [vmem:[%s5999_s1 + $0x16c] ss:$84 sps:$4 sm:$0xff]  }
  0x16   :  { %v4068_v1 = vld [vmem:[%s5999_s1 + $0x160] ss:$84 sps:$4 sm:$0xff]   ;;  %v4071_v2 = vld [vmem:[%s5999_s1 + $0x168] ss:$84 sps:$4 sm:$0xff]   ;;  %v4079_v4 = vld [vmem:[%s5999_s1 + $0xc4] ss:$84 sps:$4 sm:$0xff]  }
  0x17   :  { %1334 = vmatpush1.bf16.msra.mxu0 %v4010_v22  ;;  %1375 = vmatpush1.bf16.msra.mxu1 %v4011_v23  ;;  %v4076_v3 = vld [vmem:[%s5999_s1 + $0xbc] ss:$84 sps:$4 sm:$0xff]   ;;  %v4074_v5 = vld [vmem:[%s5999_s1 + $0xb8] ss:$84 sps:$4 sm:$0xff]   ;;  %v4077_v6 = vld [vmem:[%s5999_s1 + $0xc0] ss:$84 sps:$4 sm:$0xff]  }
  0x18   :  { %1335 = vmatprep.subr.bf16.mxu0 %v4012_v24  ;;  %1376 = vmatprep.subr.bf16.mxu1 %v4014_v25  ;;  %v4082_v7 = vld [vmem:[%s5999_s1 + $0x14] ss:$84 sps:$4 sm:$0xff]   ;;  %v4085_v8 = vld [vmem:[%s5999_s1 + $0x1c] ss:$84 sps:$4 sm:$0xff]   ;;  %v4083_v10 = vld [vmem:[%s5999_s1 + $0x18] ss:$84 sps:$4 sm:$0xff]  }
  0x19   :  { %v4080_v9 = vld [vmem:[%s5999_s1 + $0x10] ss:$84 sps:$4 sm:$0xff]   ;;  %v4086_v13 = vld [vmem:[%s5999_s1 + $0x5f8] ss:$84 sps:$4 sm:$0xff]   ;;  %v4089_v14 = vld [vmem:[%s5999_s1 + $0x600] ss:$84 sps:$4 sm:$0xff]  }
  0x1a   :  { %v4088_v11 = vld [vmem:[%s5999_s1 + $0x5fc] ss:$84 sps:$4 sm:$0xff]   ;;  %v4091_v12 = vld [vmem:[%s5999_s1 + $0x604] ss:$84 sps:$4 sm:$0xff]   ;;  %v4094_v15 = vld [vmem:[%s5999_s1 + $0x554] ss:$84 sps:$4 sm:$0xff]  }
  0x1b   :  { %1336 = vmatpush1.bf16.msra.mxu0 %v4016_v26  ;;  %1377 = vmatpush1.bf16.msra.mxu1 %v4017_v27  ;;  %v4097_v16 = vld [vmem:[%s5999_s1 + $0x55c] ss:$84 sps:$4 sm:$0xff]   ;;  %v4095_v18 = vld [vmem:[%s5999_s1 + $0x558] ss:$84 sps:$4 sm:$0xff]   ;;  %v4101_v22 = vld [vmem:[%s5999_s1 + $0x4c0] ss:$84 sps:$4 sm:$0xff]  }
  0x1c   :  { %1337 = vmatprep.subr.bf16.mxu0 %v4018_v28  ;;  %1378 = vmatprep.subr.bf16.mxu1 %v4020_v29  ;;  %v4092_v17 = vld [vmem:[%s5999_s1 + $0x550] ss:$84 sps:$4 sm:$0xff]   ;;  %v4098_v21 = vld [vmem:[%s5999_s1 + $0x4b8] ss:$84 sps:$4 sm:$0xff]   ;;  %v4106_v23 = vld [vmem:[%s5999_s1 + $0x414] ss:$84 sps:$4 sm:$0xff]  }
  0x1d   :  { %v4100_v19 = vld [vmem:[%s5999_s1 + $0x4bc] ss:$84 sps:$4 sm:$0xff]   ;;  %v4103_v20 = vld [vmem:[%s5999_s1 + $0x4c4] ss:$84 sps:$4 sm:$0xff]   ;;  %v4112_v27 = vld [vmem:[%s5999_s1 + $0x36c] ss:$84 sps:$4 sm:$0xff]  }
  0x1e   :  { %v4109_v24 = vld [vmem:[%s5999_s1 + $0x41c] ss:$84 sps:$4 sm:$0xff]   ;;  %v4107_v26 = vld [vmem:[%s5999_s1 + $0x418] ss:$84 sps:$4 sm:$0xff]   ;;  %v4115_v28 = vld [vmem:[%s5999_s1 + $0x374] ss:$84 sps:$4 sm:$0xff]  }
  0x1f   :  { %1338 = vmatpush1.bf16.msra.mxu0 %v4022_v31  ;;  %1379 = vmatpush1.bf16.msra.mxu1 %v4023_v33  ;;  %v4104_v25 = vld [vmem:[%s5999_s1 + $0x410] ss:$84 sps:$4 sm:$0xff]   ;;  %v4110_v29 = vld [vmem:[%s5999_s1 + $0x368] ss:$84 sps:$4 sm:$0xff]   ;;  %v4121_v33 = vld [vmem:[%s5999_s1 + $0x2cc] ss:$84 sps:$4 sm:$0xff]  }
  0x20   :  { %1351 = vmatprep.subr.bf16.mxu0 %v4024_v34  ;;  %1392 = vmatprep.subr.bf16.mxu1 %v4026_v35  ;;  %v4113_v30 = vld [vmem:[%s5999_s1 + $0x370] ss:$84 sps:$4 sm:$0xff]   ;;  %v4116_v34 = vld [vmem:[%s5999_s1 + $0x2c0] ss:$84 sps:$4 sm:$0xff]   ;;  %v4119_v35 = vld [vmem:[%s5999_s1 + $0x2c8] ss:$84 sps:$4 sm:$0xff]  }
  0x21   :  { %v4118_v31 = vld [vmem:[%s5999_s1 + $0x2c4] ss:$84 sps:$4 sm:$0xff]  }
  0x23   :  { %1352 = vmatpush2.bf16.msra.mxu0 %v4028_v36  ;;  %1393 = vmatpush2.bf16.msra.mxu1 %v4029_v37  ;;  %v4124_v36 = vld [vmem:[%s5999_s1 + $0x21c] ss:$84 sps:$4 sm:$0xff]   ;;  %v4127_v37 = vld [vmem:[%s5999_s1 + $0x224] ss:$84 sps:$4 sm:$0xff]  }
  0x24   :  { %1353 = vmatprep.subr.bf16.mxu0 %v4030_v38  ;;  %1394 = vmatprep.subr.bf16.mxu1 %v4032_v39  ;;  %v4122_v38 = vld [vmem:[%s5999_s1 + $0x218] ss:$84 sps:$4 sm:$0xff]   ;;  %v4125_v39 = vld [vmem:[%s5999_s1 + $0x220] ss:$84 sps:$4 sm:$0xff]  }
  0x27   :  { %1354 = vmatpush2.bf16.msra.mxu0 %v4034_v40  ;;  %1395 = vmatpush2.bf16.msra.mxu1 %v4035_v41  ;;  %v4130_v40 = vld [vmem:[%s5999_s1 + $0x174] ss:$84 sps:$4 sm:$0xff]   ;;  %v4133_v41 = vld [vmem:[%s5999_s1 + $0x17c] ss:$84 sps:$4 sm:$0xff]  }
  0x28   :  { %1405 = vmatprep.subr.bf16.mxu0 %v4040_v42  ;;  %1446 = vmatprep.subr.bf16.mxu1 %v4043_v43  ;;  %v4128_v42 = vld [vmem:[%s5999_s1 + $0x170] ss:$84 sps:$4 sm:$0xff]   ;;  %v4131_v43 = vld [vmem:[%s5999_s1 + $0x178] ss:$84 sps:$4 sm:$0xff]  }
  0x2a   :  { %1356 = vmatmul.mubr.bf16.vlgmr.msra.gmra.mxu0 %v4542_v44  ;;  %1397 = vmatmul.mubr.bf16.vlgmr.msra.gmra.mxu1 %v4542_v44 }
  0x2b   :  { %1406 = vmatpush1.bf16.msra.mxu0 %v4038_v45  ;;  %1447 = vmatpush1.bf16.msra.mxu1 %v4041_v46  ;;  %v4136_v45 = vld [vmem:[%s5999_s1 + $0xcc] ss:$84 sps:$4 sm:$0xff]   ;;  %v4139_v46 = vld [vmem:[%s5999_s1 + $0xd4] ss:$84 sps:$4 sm:$0xff]  }
  0x2c   :  { %1407 = vmatprep.subr.bf16.mxu0 %v4046_v47  ;;  %1448 = vmatprep.subr.bf16.mxu1 %v4049_v48  ;;  %v4134_v47 = vld [vmem:[%s5999_s1 + $0xc8] ss:$84 sps:$4 sm:$0xff]   ;;  %v4137_v48 = vld [vmem:[%s5999_s1 + $0xd0] ss:$84 sps:$4 sm:$0xff]  }
  0x2d   :  { %3687 = vmatprep.mubr.msk.bf16.mxu0 %vm1319_vm0, %v4503_v32  ;;  %3688 = vmatprep.mubr.msk.bf16.mxu1 %vm1319_vm0, %v4503_v32 }
  0x2f   :  { %1408 = vmatpush1.bf16.msra.mxu0 %v4044_v49  ;;  %1449 = vmatpush1.bf16.msra.mxu1 %v4047_v50  ;;  %v4142_v49 = vld [vmem:[%s5999_s1 + $0x24] ss:$84 sps:$4 sm:$0xff]   ;;  %v4145_v50 = vld [vmem:[%s5999_s1 + $0x2c] ss:$84 sps:$4 sm:$0xff]  }
  0x30   :  { %1409 = vmatprep.subr.bf16.mxu0 %v4052_v51  ;;  %1450 = vmatprep.subr.bf16.mxu1 %v4055_v52  ;;  %v4140_v51 = vld [vmem:[%s5999_s1 + $0x20] ss:$84 sps:$4 sm:$0xff]   ;;  %v4143_v52 = vld [vmem:[%s5999_s1 + $0x28] ss:$84 sps:$4 sm:$0xff]  }
  0x33   :  { %1410 = vmatpush1.bf16.msra.mxu0 %v4050_v53  ;;  %1451 = vmatpush1.bf16.msra.mxu1 %v4053_v54  ;;  %v4148_v53 = vld [vmem:[%s5999_s1 + $0x60c] ss:$84 sps:$4 sm:$0xff]   ;;  %v4151_v54 = vld [vmem:[%s5999_s1 + $0x614] ss:$84 sps:$4 sm:$0xff]  }
  0x34   :  { %1411 = vmatprep.subr.bf16.mxu0 %v4058_v55  ;;  %1452 = vmatprep.subr.bf16.mxu1 %v4061_v56  ;;  %v4146_v55 = vld [vmem:[%s5999_s1 + $0x608] ss:$84 sps:$4 sm:$0xff]   ;;  %v4149_v56 = vld [vmem:[%s5999_s1 + $0x610] ss:$84 sps:$4 sm:$0xff]  }
  0x37   :  { %1412 = vmatpush1.bf16.msra.mxu0 %v4056_v57  ;;  %1453 = vmatpush1.bf16.msra.mxu1 %v4059_v58  ;;  %v4154_v57 = vld [vmem:[%s5999_s1 + $0x564] ss:$84 sps:$4 sm:$0xff]   ;;  %v4157_v58 = vld [vmem:[%s5999_s1 + $0x56c] ss:$84 sps:$4 sm:$0xff]  }
  0x38   :  { %1413 = vmatprep.subr.bf16.mxu0 %v4064_v59  ;;  %1454 = vmatprep.subr.bf16.mxu1 %v4067_v60  ;;  %v4152_v59 = vld [vmem:[%s5999_s1 + $0x560] ss:$84 sps:$4 sm:$0xff]   ;;  %v4155_v60 = vld [vmem:[%s5999_s1 + $0x568] ss:$84 sps:$4 sm:$0xff]  }
  0x3b   :  { %1414 = vmatpush1.bf16.msra.mxu0 %v4062_v61  ;;  %1455 = vmatpush1.bf16.msra.mxu1 %v4065_v62  ;;  %v4160_v61 = vld [vmem:[%s5999_s1 + $0x4cc] ss:$84 sps:$4 sm:$0xff]   ;;  %v4163_v62 = vld [vmem:[%s5999_s1 + $0x4d4] ss:$84 sps:$4 sm:$0xff]  }
  0x3c   :  { %1415 = vmatprep.subr.bf16.mxu0 %v4070_v63  ;;  %1456 = vmatprep.subr.bf16.mxu1 %v4073_v0  ;;  %v4158_v63 = vld [vmem:[%s5999_s1 + $0x4c8] ss:$84 sps:$4 sm:$0xff]   ;;  %v4161_v0 = vld [vmem:[%s5999_s1 + $0x4d0] ss:$84 sps:$4 sm:$0xff]  }
  0x3f   :  { %1416 = vmatpush1.bf16.msra.mxu0 %v4068_v1  ;;  %1457 = vmatpush1.bf16.msra.mxu1 %v4071_v2  ;;  %v4166_v1 = vld [vmem:[%s5999_s1 + $0x424] ss:$84 sps:$4 sm:$0xff]   ;;  %v4169_v2 = vld [vmem:[%s5999_s1 + $0x42c] ss:$84 sps:$4 sm:$0xff]  }
  0x40   :  { %1417 = vmatprep.subr.bf16.mxu0 %v4076_v3  ;;  %1458 = vmatprep.subr.bf16.mxu1 %v4079_v4  ;;  %v4164_v3 = vld [vmem:[%s5999_s1 + $0x420] ss:$84 sps:$4 sm:$0xff]   ;;  %v4167_v4 = vld [vmem:[%s5999_s1 + $0x428] ss:$84 sps:$4 sm:$0xff]  }
  0x43   :  { %1418 = vmatpush1.bf16.msra.mxu0 %v4074_v5  ;;  %1459 = vmatpush1.bf16.msra.mxu1 %v4077_v6  ;;  %v4172_v5 = vld [vmem:[%s5999_s1 + $0x37c] ss:$84 sps:$4 sm:$0xff]   ;;  %v4175_v6 = vld [vmem:[%s5999_s1 + $0x384] ss:$84 sps:$4 sm:$0xff]  }
  0x44   :  { %1419 = vmatprep.subr.bf16.mxu0 %v4082_v7  ;;  %1460 = vmatprep.subr.bf16.mxu1 %v4085_v8  ;;  %v4170_v7 = vld [vmem:[%s5999_s1 + $0x378] ss:$84 sps:$4 sm:$0xff]   ;;  %v4173_v8 = vld [vmem:[%s5999_s1 + $0x380] ss:$84 sps:$4 sm:$0xff]  }
  0x47   :  { %1420 = vmatpush1.bf16.msra.mxu0 %v4080_v9  ;;  %1461 = vmatpush1.bf16.msra.mxu1 %v4083_v10  ;;  %v4178_v9 = vld [vmem:[%s5999_s1 + $0x2d4] ss:$84 sps:$4 sm:$0xff]   ;;  %v4181_v10 = vld [vmem:[%s5999_s1 + $0x2dc] ss:$84 sps:$4 sm:$0xff]  }
  0x48   :  { %1433 = vmatprep.subr.bf16.mxu0 %v4088_v11  ;;  %1474 = vmatprep.subr.bf16.mxu1 %v4091_v12  ;;  %v4176_v11 = vld [vmem:[%s5999_s1 + $0x2d0] ss:$84 sps:$4 sm:$0xff]   ;;  %v4179_v12 = vld [vmem:[%s5999_s1 + $0x2d8] ss:$84 sps:$4 sm:$0xff]  }
  0x4b   :  { %1434 = vmatpush2.bf16.msra.mxu0 %v4086_v13  ;;  %1475 = vmatpush2.bf16.msra.mxu1 %v4089_v14  ;;  %v4184_v13 = vld [vmem:[%s5999_s1 + $0x22c] ss:$84 sps:$4 sm:$0xff]   ;;  %v4187_v14 = vld [vmem:[%s5999_s1 + $0x234] ss:$84 sps:$4 sm:$0xff]  }
  0x4c   :  { %1435 = vmatprep.subr.bf16.mxu0 %v4094_v15  ;;  %1476 = vmatprep.subr.bf16.mxu1 %v4097_v16  ;;  %v4182_v15 = vld [vmem:[%s5999_s1 + $0x228] ss:$84 sps:$4 sm:$0xff]   ;;  %v4185_v16 = vld [vmem:[%s5999_s1 + $0x230] ss:$84 sps:$4 sm:$0xff]  }
  0x4f   :  { %1436 = vmatpush2.bf16.msra.mxu0 %v4092_v17  ;;  %1477 = vmatpush2.bf16.msra.mxu1 %v4095_v18  ;;  %v4190_v17 = vld [vmem:[%s5999_s1 + $0x184] ss:$84 sps:$4 sm:$0xff]   ;;  %v4193_v18 = vld [vmem:[%s5999_s1 + $0x18c] ss:$84 sps:$4 sm:$0xff]  }
  0x50   :  { %1487 = vmatprep.subr.bf16.mxu0 %v4100_v19  ;;  %1528 = vmatprep.subr.bf16.mxu1 %v4103_v20  ;;  %v4188_v19 = vld [vmem:[%s5999_s1 + $0x180] ss:$84 sps:$4 sm:$0xff]   ;;  %v4191_v20 = vld [vmem:[%s5999_s1 + $0x188] ss:$84 sps:$4 sm:$0xff]  }
  0x52   :  { %1438 = vmatmul.mubr.bf16.vlgmr.msra.gmra.mxu0 %v4542_v44  ;;  %1479 = vmatmul.mubr.bf16.vlgmr.msra.gmra.mxu1 %v4542_v44 }
  0x53   :  { %1488 = vmatpush1.bf16.msra.mxu0 %v4098_v21  ;;  %1529 = vmatpush1.bf16.msra.mxu1 %v4101_v22  ;;  %v4196_v21 = vld [vmem:[%s5999_s1 + $0xdc] ss:$84 sps:$4 sm:$0xff]   ;;  %v4199_v22 = vld [vmem:[%s5999_s1 + $0xe4] ss:$84 sps:$4 sm:$0xff]  }
  0x54   :  { %1489 = vmatprep.subr.bf16.mxu0 %v4106_v23  ;;  %1530 = vmatprep.subr.bf16.mxu1 %v4109_v24  ;;  %v4194_v23 = vld [vmem:[%s5999_s1 + $0xd8] ss:$84 sps:$4 sm:$0xff]   ;;  %v4197_v24 = vld [vmem:[%s5999_s1 + $0xe0] ss:$84 sps:$4 sm:$0xff]  }
  0x55   :  { %3689 = vmatprep.mubr.msk.bf16.mxu0 %vm1319_vm0, %v4503_v32  ;;  %3690 = vmatprep.mubr.msk.bf16.mxu1 %vm1319_vm0, %v4503_v32 }
  0x57   :  { %1490 = vmatpush1.bf16.msra.mxu0 %v4104_v25  ;;  %1531 = vmatpush1.bf16.msra.mxu1 %v4107_v26  ;;  %v4202_v25 = vld [vmem:[%s5999_s1 + $0x34] ss:$84 sps:$4 sm:$0xff]   ;;  %v4205_v26 = vld [vmem:[%s5999_s1 + $0x3c] ss:$84 sps:$4 sm:$0xff]  }
  0x58   :  { %1491 = vmatprep.subr.bf16.mxu0 %v4112_v27  ;;  %1532 = vmatprep.subr.bf16.mxu1 %v4115_v28  ;;  %v4200_v27 = vld [vmem:[%s5999_s1 + $0x30] ss:$84 sps:$4 sm:$0xff]   ;;  %v4203_v28 = vld [vmem:[%s5999_s1 + $0x38] ss:$84 sps:$4 sm:$0xff]  }
  0x5b   :  { %1492 = vmatpush1.bf16.msra.mxu0 %v4110_v29  ;;  %1533 = vmatpush1.bf16.msra.mxu1 %v4113_v30  ;;  %v4208_v29 = vld [vmem:[%s5999_s1 + $0x61c] ss:$84 sps:$4 sm:$0xff]   ;;  %v4211_v30 = vld [vmem:[%s5999_s1 + $0x624] ss:$84 sps:$4 sm:$0xff]  }
  0x5c   :  { %1493 = vmatprep.subr.bf16.mxu0 %v4118_v31  ;;  %1534 = vmatprep.subr.bf16.mxu1 %v4121_v33  ;;  %v4206_v31 = vld [vmem:[%s5999_s1 + $0x618] ss:$84 sps:$4 sm:$0xff]   ;;  %v4209_v33 = vld [vmem:[%s5999_s1 + $0x620] ss:$84 sps:$4 sm:$0xff]  }
  0x5f   :  { %1494 = vmatpush1.bf16.msra.mxu0 %v4116_v34  ;;  %1535 = vmatpush1.bf16.msra.mxu1 %v4119_v35  ;;  %v4214_v34 = vld [vmem:[%s5999_s1 + $0x574] ss:$84 sps:$4 sm:$0xff]   ;;  %v4217_v35 = vld [vmem:[%s5999_s1 + $0x57c] ss:$84 sps:$4 sm:$0xff]  }
  0x60   :  { %1495 = vmatprep.subr.bf16.mxu0 %v4124_v36  ;;  %1536 = vmatprep.subr.bf16.mxu1 %v4127_v37  ;;  %v4212_v36 = vld [vmem:[%s5999_s1 + $0x570] ss:$84 sps:$4 sm:$0xff]   ;;  %v4215_v37 = vld [vmem:[%s5999_s1 + $0x578] ss:$84 sps:$4 sm:$0xff]  }
  0x63   :  { %1496 = vmatpush1.bf16.msra.mxu0 %v4122_v38  ;;  %1537 = vmatpush1.bf16.msra.mxu1 %v4125_v39  ;;  %v4220_v38 = vld [vmem:[%s5999_s1 + $0x4dc] ss:$84 sps:$4 sm:$0xff]   ;;  %v4223_v39 = vld [vmem:[%s5999_s1 + $0x4e4] ss:$84 sps:$4 sm:$0xff]  }
  0x64   :  { %1497 = vmatprep.subr.bf16.mxu0 %v4130_v40  ;;  %1538 = vmatprep.subr.bf16.mxu1 %v4133_v41  ;;  %v4218_v40 = vld [vmem:[%s5999_s1 + $0x4d8] ss:$84 sps:$4 sm:$0xff]   ;;  %v4221_v41 = vld [vmem:[%s5999_s1 + $0x4e0] ss:$84 sps:$4 sm:$0xff]  }
  0x67   :  { %1498 = vmatpush1.bf16.msra.mxu0 %v4128_v42  ;;  %1539 = vmatpush1.bf16.msra.mxu1 %v4131_v43  ;;  %v4226_v42 = vld [vmem:[%s5999_s1 + $0x434] ss:$84 sps:$4 sm:$0xff]   ;;  %v4229_v43 = vld [vmem:[%s5999_s1 + $0x43c] ss:$84 sps:$4 sm:$0xff]  }
  0x68   :  { %1499 = vmatprep.subr.bf16.mxu0 %v4136_v45  ;;  %1540 = vmatprep.subr.bf16.mxu1 %v4139_v46  ;;  %v4224_v45 = vld [vmem:[%s5999_s1 + $0x430] ss:$84 sps:$4 sm:$0xff]   ;;  %v4227_v46 = vld [vmem:[%s5999_s1 + $0x438] ss:$84 sps:$4 sm:$0xff]  }
  0x6b   :  { %1500 = vmatpush1.bf16.msra.mxu0 %v4134_v47  ;;  %1541 = vmatpush1.bf16.msra.mxu1 %v4137_v48  ;;  %v4232_v47 = vld [vmem:[%s5999_s1 + $0x38c] ss:$84 sps:$4 sm:$0xff]   ;;  %v4235_v48 = vld [vmem:[%s5999_s1 + $0x394] ss:$84 sps:$4 sm:$0xff]  }
  0x6c   :  { %1501 = vmatprep.subr.bf16.mxu0 %v4142_v49  ;;  %1542 = vmatprep.subr.bf16.mxu1 %v4145_v50  ;;  %v4230_v49 = vld [vmem:[%s5999_s1 + $0x388] ss:$84 sps:$4 sm:$0xff]   ;;  %v4233_v50 = vld [vmem:[%s5999_s1 + $0x390] ss:$84 sps:$4 sm:$0xff]  }
  0x6f   :  { %1502 = vmatpush1.bf16.msra.mxu0 %v4140_v51  ;;  %1543 = vmatpush1.bf16.msra.mxu1 %v4143_v52  ;;  %v4238_v51 = vld [vmem:[%s5999_s1 + $0x2e4] ss:$84 sps:$4 sm:$0xff]   ;;  %v4241_v52 = vld [vmem:[%s5999_s1 + $0x2ec] ss:$84 sps:$4 sm:$0xff]  }
  0x70   :  { %1515 = vmatprep.subr.bf16.mxu0 %v4148_v53  ;;  %1556 = vmatprep.subr.bf16.mxu1 %v4151_v54  ;;  %v4236_v53 = vld [vmem:[%s5999_s1 + $0x2e0] ss:$84 sps:$4 sm:$0xff]   ;;  %v4239_v54 = vld [vmem:[%s5999_s1 + $0x2e8] ss:$84 sps:$4 sm:$0xff]  }
  0x73   :  { %1516 = vmatpush2.bf16.msra.mxu0 %v4146_v55  ;;  %1557 = vmatpush2.bf16.msra.mxu1 %v4149_v56  ;;  %v4244_v55 = vld [vmem:[%s5999_s1 + $0x23c] ss:$84 sps:$4 sm:$0xff]   ;;  %v4247_v56 = vld [vmem:[%s5999_s1 + $0x244] ss:$84 sps:$4 sm:$0xff]  }
  0x74   :  { %1517 = vmatprep.subr.bf16.mxu0 %v4154_v57  ;;  %1558 = vmatprep.subr.bf16.mxu1 %v4157_v58  ;;  %v4242_v57 = vld [vmem:[%s5999_s1 + $0x238] ss:$84 sps:$4 sm:$0xff]   ;;  %v4245_v58 = vld [vmem:[%s5999_s1 + $0x240] ss:$84 sps:$4 sm:$0xff]  }
  0x77   :  { %1518 = vmatpush2.bf16.msra.mxu0 %v4152_v59  ;;  %1559 = vmatpush2.bf16.msra.mxu1 %v4155_v60  ;;  %v4250_v59 = vld [vmem:[%s5999_s1 + $0x194] ss:$84 sps:$4 sm:$0xff]   ;;  %v4253_v60 = vld [vmem:[%s5999_s1 + $0x19c] ss:$84 sps:$4 sm:$0xff]  }
  0x78   :  { %1569 = vmatprep.subr.bf16.mxu0 %v4160_v61  ;;  %1610 = vmatprep.subr.bf16.mxu1 %v4163_v62  ;;  %v4248_v61 = vld [vmem:[%s5999_s1 + $0x190] ss:$84 sps:$4 sm:$0xff]   ;;  %v4251_v62 = vld [vmem:[%s5999_s1 + $0x198] ss:$84 sps:$4 sm:$0xff]  }
  0x7a   :  { %1520 = vmatmul.mubr.bf16.vlgmr.msra.gmra.mxu0 %v4542_v44  ;;  %1561 = vmatmul.mubr.bf16.vlgmr.msra.gmra.mxu1 %v4542_v44 }
  0x7b   :  { %1570 = vmatpush1.bf16.msra.mxu0 %v4158_v63  ;;  %1611 = vmatpush1.bf16.msra.mxu1 %v4161_v0  ;;  %v4256_v63 = vld [vmem:[%s5999_s1 + $0xec] ss:$84 sps:$4 sm:$0xff]   ;;  %v4259_v0 = vld [vmem:[%s5999_s1 + $0xf4] ss:$84 sps:$4 sm:$0xff]  }
  0x7c   :  { %1571 = vmatprep.subr.bf16.mxu0 %v4166_v1  ;;  %1612 = vmatprep.subr.bf16.mxu1 %v4169_v2  ;;  %v4254_v1 = vld [vmem:[%s5999_s1 + $0xe8] ss:$84 sps:$4 sm:$0xff]   ;;  %v4257_v2 = vld [vmem:[%s5999_s1 + $0xf0] ss:$84 sps:$4 sm:$0xff]  }
  0x7d   :  { %3691 = vmatprep.mubr.msk.bf16.mxu0 %vm1319_vm0, %v4503_v32  ;;  %3692 = vmatprep.mubr.msk.bf16.mxu1 %vm1319_vm0, %v4503_v32 }
  0x7f   :  { %1572 = vmatpush1.bf16.msra.mxu0 %v4164_v3  ;;  %1613 = vmatpush1.bf16.msra.mxu1 %v4167_v4  ;;  %v4262_v3 = vld [vmem:[%s5999_s1 + $0x44] ss:$84 sps:$4 sm:$0xff]   ;;  %v4265_v4 = vld [vmem:[%s5999_s1 + $0x4c] ss:$84 sps:$4 sm:$0xff]  }
  0x80   :  { %1573 = vmatprep.subr.bf16.mxu0 %v4172_v5  ;;  %1614 = vmatprep.subr.bf16.mxu1 %v4175_v6  ;;  %v4260_v5 = vld [vmem:[%s5999_s1 + $0x40] ss:$84 sps:$4 sm:$0xff]   ;;  %v4263_v6 = vld [vmem:[%s5999_s1 + $0x48] ss:$84 sps:$4 sm:$0xff]  }
  0x83   :  { %1574 = vmatpush1.bf16.msra.mxu0 %v4170_v7  ;;  %1615 = vmatpush1.bf16.msra.mxu1 %v4173_v8  ;;  %v4268_v7 = vld [vmem:[%s5999_s1 + $0x62c] ss:$84 sps:$4 sm:$0xff]   ;;  %v4271_v8 = vld [vmem:[%s5999_s1 + $0x634] ss:$84 sps:$4 sm:$0xff]  }
  0x84   :  { %1575 = vmatprep.subr.bf16.mxu0 %v4178_v9  ;;  %1616 = vmatprep.subr.bf16.mxu1 %v4181_v10  ;;  %v4266_v9 = vld [vmem:[%s5999_s1 + $0x628] ss:$84 sps:$4 sm:$0xff]   ;;  %v4269_v10 = vld [vmem:[%s5999_s1 + $0x630] ss:$84 sps:$4 sm:$0xff]  }
  0x87   :  { %1576 = vmatpush1.bf16.msra.mxu0 %v4176_v11  ;;  %1617 = vmatpush1.bf16.msra.mxu1 %v4179_v12  ;;  %v4274_v11 = vld [vmem:[%s5999_s1 + $0x584] ss:$84 sps:$4 sm:$0xff]   ;;  %v4277_v12 = vld [vmem:[%s5999_s1 + $0x58c] ss:$84 sps:$4 sm:$0xff]  }
  0x88   :  { %1577 = vmatprep.subr.bf16.mxu0 %v4184_v13  ;;  %1618 = vmatprep.subr.bf16.mxu1 %v4187_v14  ;;  %v4272_v13 = vld [vmem:[%s5999_s1 + $0x580] ss:$84 sps:$4 sm:$0xff]   ;;  %v4275_v14 = vld [vmem:[%s5999_s1 + $0x588] ss:$84 sps:$4 sm:$0xff]  }
  0x8b   :  { %1578 = vmatpush1.bf16.msra.mxu0 %v4182_v15  ;;  %1619 = vmatpush1.bf16.msra.mxu1 %v4185_v16  ;;  %v5045_v15 = vld [vmem:[%s6001_s5 + $0x4] ss:$28 sps:$4 sm:$0xff]  }
  0x8c   :  { %1579 = vmatprep.subr.bf16.mxu0 %v4190_v17  ;;  %1620 = vmatprep.subr.bf16.mxu1 %v4193_v18  ;;  %v5050_v16 = vld [vmem:[%s6001_s5] ss:$28 sps:$4 sm:$0xff]   ;;  %v4354_v18 = vmov 0  }
  0x8d   :  { %v4281_v17 = vld [vmem:[%s5999_s1 + $0x4e8] ss:$84 sps:$4 sm:$0xff]  }
  0x8f   :  { %1580 = vmatpush1.bf16.msra.mxu0 %v4188_v19  ;;  %1621 = vmatpush1.bf16.msra.mxu1 %v4191_v20  ;;  %v4285_v19 = vld [vmem:[%s6001_s5 + $0x14] ss:$28 sps:$4 sm:$0xff]  }
  0x90   :  { %1581 = vmatprep.subr.bf16.mxu0 %v4196_v21  ;;  %1622 = vmatprep.subr.bf16.mxu1 %v4199_v22  ;;  %v4282_v20 = vld [vmem:[%s5999_s1 + $0x440] ss:$84 sps:$4 sm:$0xff]   ;;  %v1916_v22 = vld [vmem:[%s6002_s3 + $0x18] sm:$0xff] }
  0x91   :  { %v1915_v21 = vld [vmem:[%s6002_s3 + $0x10] sm:$0xff] }
  0x93   :  { %1582 = vmatpush1.bf16.msra.mxu0 %v4194_v23  ;;  %1623 = vmatpush1.bf16.msra.mxu1 %v4197_v24  ;;  %v5076_v23 = vpack.c.bf16 %v1916_v22, %v1915_v21  ;;  %v4283_v24 = vld [vmem:[%s6001_s5 + $0x10] ss:$28 sps:$4 sm:$0xff]  }
  0x94   :  { %1583 = vmatprep.subr.bf16.mxu0 %v4202_v25  ;;  %1624 = vmatprep.subr.bf16.mxu1 %v4205_v26  ;;  %v4286_v25 = vld [vmem:[%s5999_s1 + $0x398] ss:$84 sps:$4 sm:$0xff]   ;;  %v4287_v26 = vld [vmem:[%s5999_s1 + $0x2f0] ss:$84 sps:$4 sm:$0xff]  }
  0x97   :  { %1584 = vmatpush1.bf16.msra.mxu0 %v4200_v27  ;;  %1625 = vmatpush1.bf16.msra.mxu1 %v4203_v28  ;;  %v1917_v27 = vld [vmem:[%s6002_s3 + $0x20] sm:$0xff]  ;;  %v1918_v28 = vld [vmem:[%s6002_s3 + $0x28] sm:$0xff] }
  0x98   :  { %1597 = vmatprep.subr.bf16.mxu0 %v4208_v29  ;;  %1638 = vmatprep.subr.bf16.mxu1 %v4211_v30  ;;  %v5101_v29 = vpack.c.bf16 %v1918_v28, %v1917_v27  ;;  %v4288_v30 = vld [vmem:[%s5999_s1 + $0x248] ss:$84 sps:$4 sm:$0xff]   ;;  %v4301_v27 = vld [vmem:[%s6005_s7 + $0x30] sm:$0xff]  }
  0x99   :  { %v4302_v28 = vld [vmem:[%s6005_s7 + $0x68] sm:$0xff]  }
  0x9b   :  { %1598 = vmatpush2.bf16.msra.mxu0 %v4206_v31  ;;  %1639 = vmatpush2.bf16.msra.mxu1 %v4209_v33  ;;  %v4289_v31 = vld [vmem:[%s5999_s1 + $0x1a0] ss:$84 sps:$4 sm:$0xff]  }
  0x9c   :  { %1599 = vmatprep.subr.bf16.mxu0 %v4214_v34  ;;  %1640 = vmatprep.subr.bf16.mxu1 %v4217_v35  ;;  %v1919_v33 = vld [vmem:[%s6002_s3 + $0x30] sm:$0xff]  ;;  %v1920_v34 = vld [vmem:[%s6002_s3 + $0x38] sm:$0xff] }
  0x9d   :  { %v5120_v35 = vpack.c.bf16 %v1920_v34, %v1919_v33  ;;  %v4306_v33 = vld [vmem:[%s6005_s7 + $0x20] sm:$0xff]   ;;  %v4307_v34 = vld [vmem:[%s6005_s7 + $0xb8] sm:$0xff]  }
  0x9f   :  { %1600 = vmatpush2.bf16.msra.mxu0 %v4212_v36  ;;  %1641 = vmatpush2.bf16.msra.mxu1 %v4215_v37  ;;  %v4290_v36 = vld [vmem:[%s5999_s1 + $0xf8] ss:$84 sps:$4 sm:$0xff]   ;;  %v4291_v37 = vld [vmem:[%s5999_s1 + $0x50] ss:$84 sps:$4 sm:$0xff]  }
  0xa0   :  { %1651 = vmatprep.subr.bf16.mxu0 %v4220_v38  ;;  %1692 = vmatprep.subr.bf16.mxu1 %v4223_v39  ;;  %v1921_v38 = vld [vmem:[%s6002_s3 + $0x40] sm:$0xff] }
  0xa1   :  { %v5136_v39 = vpack.c.bf16 %v1921_v38, %v1921_v38  ;;  %v4311_v38 = vld [vmem:[%s6005_s7 + $0xb0] sm:$0xff]  }
  0xa2   :  { %1602 = vmatmul.mubr.bf16.vlgmr.msra.gmra.mxu0 %v4542_v44  ;;  %1643 = vmatmul.mubr.bf16.vlgmr.msra.gmra.mxu1 %v4542_v44 }
  0xa3   :  { %1652 = vmatpush1.bf16.msra.mxu0 %v4218_v40  ;;  %1693 = vmatpush1.bf16.msra.mxu1 %v4221_v41  ;;  %v4292_v40 = vld [vmem:[%s5999_s1 + $0x638] ss:$84 sps:$4 sm:$0xff]  }
  0xa4   :  { %1653 = vmatprep.subr.bf16.mxu0 %v4226_v42  ;;  %1694 = vmatprep.subr.bf16.mxu1 %v4229_v43  ;;  %v4293_v43 = vld [vmem:[%s5999_s1 + $0x590] ss:$84 sps:$4 sm:$0xff]  }
  0xa5   :  { %3693 = vmatprep.mubr.msk.bf16.mxu0 %vm1319_vm0, %v4503_v32  ;;  %3694 = vmatprep.mubr.msk.bf16.mxu1 %vm1319_vm0, %v4503_v32 }
  0xa7   :  { %1654 = vmatpush1.bf16.msra.mxu0 %v4224_v45  ;;  %1695 = vmatpush1.bf16.msra.mxu1 %v4227_v46  ;;  %v1913_v45 = vld [vmem:[%s6002_s3] sm:$0xff]  ;;  %v1914_v46 = vld [vmem:[%s6002_s3 + $0x8] sm:$0xff] }
  0xa8   :  { %1655 = vmatprep.subr.bf16.mxu0 %v4232_v47  ;;  %1696 = vmatprep.subr.bf16.mxu1 %v4235_v48 }
  0xab   :  { %1656 = vmatpush1.bf16.msra.mxu0 %v4230_v49  ;;  %1697 = vmatpush1.bf16.msra.mxu1 %v4233_v50 }
  0xac   :  { %1657 = vmatprep.subr.bf16.mxu0 %v4238_v51  ;;  %1698 = vmatprep.subr.bf16.mxu1 %v4241_v52  ;;  %v5163_v51 = vpack.c.bf16 %v1914_v46, %v1913_v45  ;;  %v4315_v45 = vld [vmem:[%s6005_s7 + $0xa8] sm:$0xff]  }
  0xad   :  { %v4316_v46 = vld [vmem:[%s6005_s7 + $0x48] sm:$0xff]  }
  0xaf   :  { %1658 = vmatpush1.bf16.msra.mxu0 %v4236_v53  ;;  %1699 = vmatpush1.bf16.msra.mxu1 %v4239_v54  ;;  %v2312_v54 = vld [vmem:[%s6003_s6 + $0x38] sm:$0xff] }
  0xb0   :  { %1659 = vmatprep.subr.bf16.mxu0 %v4244_v55  ;;  %1700 = vmatprep.subr.bf16.mxu1 %v4247_v56  ;;  %v4296_v55 = vld [vmem:[%s6001_s5 + $0xc] ss:$28 sps:$4 sm:$0xff]  }
  0xb1   :  { %v2306_v56 = vld [vmem:[%s6003_s6 + $0x8] sm:$0xff] }
  0xb3   :  { %1660 = vmatpush1.bf16.msra.mxu0 %v4242_v57  ;;  %1701 = vmatpush1.bf16.msra.mxu1 %v4245_v58  ;;  %v2305_v57 = vld [vmem:[%s6003_s6] sm:$0xff] }
  0xb4   :  { %1661 = vmatprep.subr.bf16.mxu0 %v4250_v59  ;;  %1702 = vmatprep.subr.bf16.mxu1 %v4253_v60  ;;  %v4294_v58 = vld [vmem:[%s6001_s5 + $0x8] ss:$28 sps:$4 sm:$0xff]   ;;  %v4355_v59 = vmov 0.0   ;;  %v4297_v60 = vld [vmem:[%s6001_s5 + $0x18] ss:$28 sps:$4 sm:$0xff]  }
  0xb7   :  { %1662 = vmatpush1.bf16.msra.mxu0 %v4248_v61  ;;  %1703 = vmatpush1.bf16.msra.mxu1 %v4251_v62 }
  0xb8   :  { %1663 = vmatprep.subr.bf16.mxu0 %v4256_v63  ;;  %1704 = vmatprep.subr.bf16.mxu1 %v4259_v0 }
  0xbb   :  { %1664 = vmatpush1.bf16.msra.mxu0 %v4254_v1  ;;  %1705 = vmatpush1.bf16.msra.mxu1 %v4257_v2 }
  0xbc   :  { %1665 = vmatprep.subr.bf16.mxu0 %v4262_v3  ;;  %1706 = vmatprep.subr.bf16.mxu1 %v4265_v4  ;;  %v2302_v3 = vld [vmem:[%s6004_s4] sm:$0xff] }
  0xbf   :  { %1666 = vmatpush1.bf16.msra.mxu0 %v4260_v5  ;;  %1707 = vmatpush1.bf16.msra.mxu1 %v4263_v6  ;;  %v2314_v6 = vld [vmem:[%s6003_s6 + $0x48] sm:$0xff] }
  0xc0   :  { %1679 = vmatprep.subr.bf16.mxu0 %v4268_v7  ;;  %1720 = vmatprep.subr.bf16.mxu1 %v4271_v8  ;;  %v2308_v7 = vld [vmem:[%s6003_s6 + $0x18] sm:$0xff]  ;;  %v2307_v8 = vld [vmem:[%s6003_s6 + $0x10] sm:$0xff] }
  0xc3   :  { %1680 = vmatpush2.bf16.msra.mxu0 %v4266_v9  ;;  %1721 = vmatpush2.bf16.msra.mxu1 %v4269_v10  ;;  %v2303_v9 = vld [vmem:[%s6004_s4 + $0x8] sm:$0xff]  ;;  %v2317_v10 = vld [vmem:[%s6003_s6 + $0x60] sm:$0xff] }
  0xc4   :  { %1681 = vmatprep.subr.bf16.mxu0 %v4274_v11  ;;  %1722 = vmatprep.subr.bf16.mxu1 %v4277_v12  ;;  %v2304_v11 = vld [vmem:[%s6004_s4 + $0x10] sm:$0xff]  ;;  %v2316_v12 = vld [vmem:[%s6003_s6 + $0x58] sm:$0xff] }
  0xc7   :  { %1682 = vmatpush2.bf16.msra.mxu0 %v4272_v13  ;;  %1723 = vmatpush2.bf16.msra.mxu1 %v4275_v14  ;;  %v2310_v13 = vld [vmem:[%s6003_s6 + $0x28] sm:$0xff]  ;;  %v2309_v14 = vld [vmem:[%s6003_s6 + $0x20] sm:$0xff] }
  0xc8   :  { %1733 = vmatprep.subr.bf16.mxu0 %v4354_v18  ;;  %3971 = vmatprep.subr.bf16.mxu1 %v5045_v15 }
  0xca   :  { %1684 = vmatmul.mubr.bf16.vlgmr.msra.gmra.mxu0 %v4542_v44  ;;  %1725 = vmatmul.mubr.bf16.vlgmr.msra.gmra.mxu1 %v4542_v44 }
  0xcb   :  { %1734 = vmatpush1.bf16.msra.mxu0 %v4281_v17  ;;  %3972 = vmatpush1.bf16.msra.mxu1 %v5050_v16 }
  0xcc   :  { %1735 = vmatprep.subr.bf16.mxu0 %v4354_v18  ;;  %2029 = vmatprep.mubr.bf16.mxu1 %v4354_v18 }
  0xcd   :  { %2163 = vmatprep.subr.bf16.mxu1 %v4285_v19  ;;  %3695 = vmatprep.mubr.msk.bf16.mxu0 %vm1319_vm0, %v4503_v32  ;;  %v2313_v32 = vld [vmem:[%s6003_s6 + $0x40] sm:$0xff] }
  0xcf   :  { %1736 = vmatpush1.bf16.msra.mxu0 %v4282_v20 }
  0xd0   :  { %1737 = vmatprep.subr.bf16.mxu0 %v4354_v18 }
  0xd2   :  { %3708 = vmatmul.mubr.msk.bf16.vlgmr.msra.gmra.mxu1 %vm1971_vm1, %v5076_v23 }
  0xd3   :  { %1738 = vmatpush1.bf16.msra.mxu0 %v4286_v25  ;;  %2164 = vmatpush1.bf16.msra.mxu1 %v4283_v24  ;;  %v4298_v25 = vld [vmem:[%s6005_s7 + $0x78] sm:$0xff]  }
  0xd4   :  { %1739 = vmatprep.subr.bf16.mxu0 %v4354_v18  ;;  %2039 = vmatprep.mubr.bf16.mxu1 %v4354_v18 }
  0xd5   :  { %2356 = vmatprep.subr.mxu1 %v2313_v32  ;;  %v4299_v32 = vld [vmem:[%s6005_s7 + $0x38] sm:$0xff]  }
  0xd7   :  { %1740 = vmatpush1.bf16.msra.mxu0 %v4287_v26  ;;  %v4300_v26 = vld [vmem:[%s6005_s7 + $0x70] sm:$0xff]  }
  0xd8   :  { %1741 = vmatprep.subr.bf16.mxu0 %v4354_v18 }
  0xda   :  { %3709 = vmatmul.mubr.msk.bf16.gmra.mxu1 %vm1971_vm1, %v5101_v29 }
  0xdb   :  { %1742 = vmatpush1.bf16.msra.mxu0 %v4288_v30  ;;  %2049 = vmatprep.mubr.bf16.mxu1 %v4354_v18  ;;  %v4304_v30 = vld [vmem:[%s6005_s7 + $0x60] sm:$0xff]  }
  0xdc   :  { %1743 = vmatprep.subr.bf16.mxu0 %v4354_v18 }
  0xdf   :  { %1744 = vmatpush1.bf16.msra.mxu0 %v4289_v31  ;;  %v4305_v31 = vld [vmem:[%s6005_s7 + $0xf8] sm:$0xff]  }
  0xe0   :  { %1745 = vmatprep.subr.bf16.mxu0 %v4354_v18 }
  0xe2   :  { %3710 = vmatmul.mubr.msk.bf16.gmra.mxu1 %vm1971_vm1, %v5120_v35 }
  0xe3   :  { %1746 = vmatpush1.bf16.msra.mxu0 %v4290_v36  ;;  %2059 = vmatprep.mubr.bf16.mxu1 %v4354_v18  ;;  %v4309_v36 = vld [vmem:[%s6005_s7 + $0xf0] sm:$0xff]  }
  0xe4   :  { %1747 = vmatprep.subr.bf16.mxu0 %v4354_v18 }
  0xe7   :  { %1748 = vmatpush1.bf16.msra.mxu0 %v4291_v37  ;;  %v4310_v37 = vld [vmem:[%s6005_s7 + $0x18] sm:$0xff]  }
  0xe8   :  { %1761 = vmatprep.subr.bf16.mxu0 %v4354_v18 }
  0xea   :  { %v5142_v41 = vpop.f32.mrf.mxu0  ;;  %v5144_v42 = vpop.f32.mrf.mxu1  ;;  %3711 = vmatmul.mubr.msk.bf16.gmra.mxu1 %vm1971_vm1, %v5136_v39 }
  0xeb   :  { %1762 = vmatpush2.bf16.msra.mxu0 %v4292_v40  ;;  %2181 = vmatprep.mubr.bf16.mxu1 %v4354_v18  ;;  %v4313_v40 = vld [vmem:[%s6005_s7 + $0xe8] sm:$0xff]  }
  0xec   :  { %v5158_v47 = vpop.f32.mrf.mxu0  ;;  %v5160_v48 = vpop.f32.mrf.mxu1  ;;  %1763 = vmatprep.subr.bf16.mxu0 %v4354_v18 }
  0xee   :  { %v1361_v49 = vpop.f32.mrf.mxu0  ;;  %v1402_v50 = vpop.f32.mrf.mxu1 }
  0xef   :  { %1764 = vmatpush2.bf16.msra.mxu0 %v4293_v43  ;;  %v4314_v43 = vld [vmem:[%s6005_s7 + $0x10] sm:$0xff]   ;;  %v4317_v49 = vld [vmem:[%s6005_s7 + $0xe0] sm:$0xff]   ;;  %v4318_v50 = vld [vmem:[%s6005_s7 + $0x8] sm:$0xff]  }
  0xf0   :  { %v1362_v52 = vpop.f32.mrf.mxu0  ;;  %v1403_v53 = vpop.f32.mrf.mxu1  ;;  %2001 = vmatprep.subr.bf16.mxu0 %v5045_v15  ;;  %v2318_v15 = vld [vmem:[%s6003_s6 + $0x68] sm:$0xff] }
  0xf2   :  { %1766 = vmatmul.mubr.bf16.vlgmr.msra.gmra.mxu0 %v4542_v44  ;;  %3717 = vmatmul.mubr.msk.bf16.vlgmr.msra.gmra.mxu1 %vm1971_vm1, %v5163_v51  ;;  %v2315_v44 = vld [vmem:[%s6003_s6 + $0x50] sm:$0xff] }
  0xf3   :  { %2357 = vmatpush1.msra.mxu1 %v2312_v54  ;;  %2002 = vmatpush1.bf16.msra.mxu0 %v5050_v16  ;;  %v2311_v16 = vld [vmem:[%s6003_s6 + $0x30] sm:$0xff] }
  0xf4   :  { %2019 = vmatprep.mubr.bf16.mxu0 %v4354_v18  ;;  %2191 = vmatprep.mubr.bf16.mxu1 %v4354_v18 }
  0xf5   :  { %2082 = vmatprep.subr.bf16.mxu0 %v4296_v55  ;;  %2358 = vmatprep.subr.mxu1 %v2306_v56  ;;  %v4320_v56 = vld [vmem:[%s6005_s7 + $0x40] sm:$0xff]  }
  0xf6   :  { %2359 = vmatpush1.msra.mxu1 %v2305_v57  ;;  %v4321_v57 = vld [vmem:[%s6005_s7 + $0xd8] sm:$0xff]  }
  0xf7   :  { %2439 = vmatprep.subr.mxu1 %v2315_v44  ;;  %v4322_v44 = vld [vmem:[%s6005_s7] sm:$0xff]  }
  0xfa   :  { %3707 = vmatmul.mubr.msk.bf16.vlgmr.msra.gmra.mxu0 %vm1971_vm1, %v5163_v51  ;;  %3718 = vmatmul.mubr.msk.bf16.gmra.mxu1 %vm1971_vm1, %v5076_v23 }
  0xfb   :  { %2083 = vmatpush1.bf16.msra.mxu0 %v4294_v58  ;;  %2100 = vmatprep.mubr.bf16.mxu0 %v4354_v18  ;;  %v4323_v58 = vld [vmem:[%s6005_s7 + $0x98] sm:$0xff]  }
  0xfc   :  { %2201 = vmatprep.mubr.bf16.mxu1 %v4354_v18  ;;  %3916 = vmatprep.subr.bf16.mxu0 %v4355_v59 }
 0x102   :  { %3712 = vmatmul.mubr.msk.bf16.vlgmr.msra.gmra.mxu0 %vm1971_vm1, %v5163_v51  ;;  %3719 = vmatmul.mubr.msk.bf16.gmra.mxu1 %vm1971_vm1, %v5101_v29 }
 0x103   :  { %3917 = vmatpush3.bf16.msra.mxu0 %v4297_v60  ;;  %2110 = vmatprep.mubr.bf16.mxu0 %v4354_v18 }
 0x104   :  { %2211 = vmatprep.mubr.bf16.mxu1 %v4354_v18  ;;  %3822 = vmatprep.subr.bf16.mxu0 %v4298_v25 }
 0x10a   :  { %3713 = vmatmul.mubr.msk.bf16.gmra.mxu0 %vm1971_vm1, %v5076_v23  ;;  %3720 = vmatmul.mubr.msk.bf16.gmra.mxu1 %vm1971_vm1, %v5120_v35 }
 0x10b   :  { %2120 = vmatprep.mubr.bf16.mxu0 %v4354_v18  ;;  %2221 = vmatprep.mubr.bf16.mxu1 %v4354_v18 }
 0x112   :  { %v5212_v61 = vpop.f32.mrf.mxu0  ;;  %v5214_v62 = vpop.f32.mrf.mxu1  ;;  %3714 = vmatmul.mubr.msk.bf16.gmra.mxu0 %vm1971_vm1, %v5101_v29  ;;  %3721 = vmatmul.mubr.msk.bf16.gmra.mxu1 %vm1971_vm1, %v5136_v39 }
 0x113   :  { %2130 = vmatprep.mubr.bf16.mxu0 %v4354_v18  ;;  %2392 = vmatprep.mubr.f32.mxu1 %v4355_v59 }
 0x114   :  { %v5222_v63 = vpop.f32.mrf.mxu0  ;;  %v5224_v0 = vpop.f32.mrf.mxu1 }
 0x115   :  { %6010 = vst [vmem:[#allocation2_spill] sm:$0xff] %v5222_v63 }
 0x116   :  { %v1443_v1 = vpop.f32.mrf.mxu0  ;;  %v1484_v2 = vpop.f32.mrf.mxu1 }
 0x118   :  { %v1444_v4 = vpop.f32.mrf.mxu0  ;;  %v1485_v5 = vpop.f32.mrf.mxu1 }
 0x119   :  { %v4325_v4 = vld [vmem:[%s6005_s7 + $0x178] sm:$0xff]   ;;  %v4326_v5 = vld [vmem:[%s6005_s7 + $0x90] sm:$0xff]  }
 0x11a   :  { %3715 = vmatmul.mubr.msk.bf16.gmra.mxu0 %vm1971_vm1, %v5120_v35  ;;  %3727 = vmatmul.mubr.msk.f32.vlgmr.msra.gmra.mxu1 %vm1971_vm1, %v2302_v3 }
 0x11b   :  { %2440 = vmatpush1.msra.mxu1 %v2314_v6  ;;  %2398 = vmatprep.mubr.f32.mxu1 %v4355_v59  ;;  %v4328_v6 = vld [vmem:[%s6005_s7 + $0xc8] sm:$0xff]  }
 0x11c   :  { %2441 = vmatprep.subr.mxu1 %v2308_v7  ;;  %2140 = vmatprep.mubr.bf16.mxu0 %v4354_v18  ;;  %v4330_v7 = vld [vmem:[%s6005_s7 + $0x88] sm:$0xff]  }
 0x11d   :  { %2442 = vmatpush1.msra.mxu1 %v2307_v8  ;;  %v4332_v8 = vld [vmem:[%s6005_s7 + $0xc0] sm:$0xff]  }
 0x11e   :  { %3728 = vmatmul.mubr.msk.f32.gmra.mxu1 %vm1971_vm1, %v2303_v9  ;;  %2522 = vmatprep.subr.mxu1 %v2317_v10  ;;  %v5429_v10 = vld [vmem:[%s6005_s7 + $0x1b8] sm:$0xff]  }
 0x11f   :  { %2404 = vmatprep.mubr.f32.mxu1 %v4355_v59  ;;  %6014 = vst [vmem:[#allocation6_spill] sm:$0xff] %v5429_v10 }
 0x122   :  { %3716 = vmatmul.mubr.msk.bf16.gmra.mxu0 %vm1971_vm1, %v5136_v39  ;;  %3729 = vmatmul.mubr.msk.f32.gmra.mxu1 %vm1971_vm1, %v2304_v11 }
 0x123   :  { %2475 = vmatprep.mubr.f32.mxu1 %v4355_v59  ;;  %3918 = vmatprep.mubr.msk.bf16.mxu0 %vm4356_vm2, %v4355_v59 }
 0x126   :  { %3730 = vmatmul.mubr.msk.f32.vlgmr.msra.gmra.mxu1 %vm1971_vm1, %v2302_v3 }
 0x127   :  { %2481 = vmatprep.mubr.f32.mxu1 %v4355_v59  ;;  %2523 = vmatpush1.msra.mxu1 %v2316_v12  ;;  %v3698_v12 = vld [vmem:[%s6006_s2 + $0x2] ss:$8 sm:$0xf] }
 0x128   :  { %2524 = vmatprep.subr.mxu1 %v2310_v13  ;;  %v3699_v13 = vld [vmem:[%s6006_s2 + $0x2] ss:$8 sm:$0xf0] }
 0x129   :  { %2525 = vmatpush1.msra.mxu1 %v2309_v14 }
 0x12a   :  { %3919 = vmatmul.mubr.msk.bf16.vlgmr.msra.gmra.mxu0 %vm1971_vm1, %v5163_v51  ;;  %3731 = vmatmul.mubr.msk.f32.gmra.mxu1 %vm1971_vm1, %v2303_v9  ;;  %v4319_v51 = vld [vmem:[%s6005_s7 + $0xa0] sm:$0xff]  }
 0x12b   :  { %2487 = vmatprep.mubr.f32.mxu1 %v4355_v59  ;;  %3922 = vmatprep.mubr.msk.bf16.mxu0 %vm4356_vm2, %v4355_v59 }
 0x12c   :  { %3938 = vmatprep.subr.mxu1 %v4355_v59  ;;  %3823 = vmatpush3.bf16.msra.mxu0 %v4299_v32 }
 0x12d   :  { %3824 = vmatprep.subr.bf16.mxu0 %v4300_v26 }
 0x12e   :  { %3732 = vmatmul.mubr.msk.f32.gmra.mxu1 %vm1971_vm1, %v2304_v11 }
 0x12f   :  { %2558 = vmatprep.mubr.f32.mxu1 %v4355_v59 }
 0x130   :  { %3825 = vmatpush3.bf16.msra.mxu0 %v4301_v27 }
 0x131   :  { %3826 = vmatprep.subr.bf16.mxu0 %v4302_v28  ;;  %v3696_v28 = vld [vmem:[%s6006_s2 + $0x1] ss:$8 sm:$0xf] }
 0x132   :  { %3923 = vmatmul.mubr.msk.bf16.gmra.mxu0 %vm1971_vm1, %v5076_v23  ;;  %3733 = vmatmul.mubr.msk.f32.vlgmr.msra.gmra.mxu1 %vm1971_vm1, %v2302_v3 }
 0x133   :  { %2564 = vmatprep.mubr.f32.mxu1 %v4355_v59  ;;  %3926 = vmatprep.mubr.msk.bf16.mxu0 %vm4356_vm2, %v4355_v59 }
 0x134   :  { %3939 = vmatpush3.msra.mxu1 %v2318_v15  ;;  %v5440_v15 = vor.u32 %v3699_v13, %v3698_v12 }
 0x135   :  { %3940 = vmatprep.subr.mxu1 %v4355_v59 }
 0x136   :  { %3734 = vmatmul.mubr.msk.f32.gmra.mxu1 %vm1971_vm1, %v2303_v9 }
 0x137   :  { %2570 = vmatprep.mubr.f32.mxu1 %v4355_v59  ;;  %3941 = vmatpush3.msra.mxu1 %v2311_v16 }
 0x138   :  { %3850 = vmatprep.subr.bf16.mxu1 %v4305_v31 }
 0x13a   :  { %v5295_v17 = vpop.f32.mrf.mxu0  ;;  %v5297_v18 = vpop.f32.mrf.mxu1  ;;  %3927 = vmatmul.mubr.msk.bf16.gmra.mxu0 %vm1971_vm1, %v5101_v29  ;;  %3735 = vmatmul.mubr.msk.f32.gmra.mxu1 %vm1971_vm1, %v2304_v11  ;;  %v4303_v29 = vld [vmem:[%s6005_s7 + $0x28] sm:$0xff]  }
 0x13b   :  { %3942 = vmatprep.mubr.msk.f32.mxu1 %vm4356_vm2, %v4355_v59  ;;  %3930 = vmatprep.mubr.msk.bf16.mxu0 %vm4356_vm2, %v4355_v59 }
 0x13c   :  { %v5306_v19 = vpop.f32.mrf.mxu0  ;;  %v5308_v20 = vpop.f32.mrf.mxu1  ;;  %3827 = vmatpush3.bf16.msra.mxu0 %v4303_v29  ;;  %v3697_v29 = vld [vmem:[%s6006_s2 + $0x1] ss:$8 sm:$0xf0] }
 0x13d   :  { %6011 = vst [vmem:[#allocation3_spill] sm:$0xff] %v5308_v20  ;;  %3828 = vmatprep.subr.bf16.mxu0 %v4304_v30 }
 0x13e   :  { %v1525_v21 = vpop.f32.mrf.mxu0  ;;  %v1566_v22 = vpop.f32.mrf.mxu1  ;;  %3943 = vmatmul.mubr.msk.f32.vlgmr.msra.gmra.mxu1 %vm1971_vm1, %v2302_v3  ;;  %v4324_v3 = vld [vmem:[%s6005_s7 + $0xd0] sm:$0xff]  }
 0x13f   :  { %3945 = vmatprep.mubr.msk.f32.mxu1 %vm4356_vm2, %v4355_v59  ;;  %3851 = vmatpush3.bf16.msra.mxu1 %v4307_v34 }
 0x140   :  { %v1526_v23 = vpop.f32.mrf.mxu0  ;;  %v1567_v24 = vpop.f32.mrf.mxu1  ;;  %3829 = vmatpush3.bf16.msra.mxu0 %v4306_v33  ;;  %3852 = vmatprep.subr.bf16.mxu1 %v4309_v36 }
 0x141   :  { %v1773_v23 = vld [vmem:[%s6006_s2] ss:$8 sm:$0xf] }
 0x142   :  { %3931 = vmatmul.mubr.msk.bf16.gmra.mxu0 %vm1971_vm1, %v5120_v35  ;;  %3946 = vmatmul.mubr.msk.f32.gmra.mxu1 %vm1971_vm1, %v2303_v9  ;;  %v4308_v35 = vld [vmem:[%s6005_s7 + $0x58] sm:$0xff]   ;;  %v4334_v9 = vld [vmem:[%s6005_s7 + $0x80] sm:$0xff]  }
 0x143   :  { %3948 = vmatprep.mubr.msk.f32.mxu1 %vm4356_vm2, %v4355_v59  ;;  %3934 = vmatprep.mubr.msk.bf16.mxu0 %vm4356_vm2, %v4355_v59  ;;  %v1774_v24 = vld [vmem:[%s6006_s2] ss:$8 sm:$0xf0] }
 0x144   :  { %3830 = vmatprep.subr.bf16.mxu0 %v4308_v35  ;;  %3853 = vmatpush3.bf16.msra.mxu1 %v4311_v38  ;;  %v5465_v33 = vor.u32 %v1774_v24, %v1773_v23  ;;  %v5469_v38 = vor.u32 %v3697_v29, %v3696_v28 }
 0x145   :  { %3831 = vmatpush3.bf16.msra.mxu0 %v4310_v37  ;;  %3854 = vmatprep.subr.bf16.mxu1 %v4313_v40 }
 0x146   :  { %3949 = vmatmul.mubr.msk.f32.gmra.mxu1 %vm1971_vm1, %v2304_v11  ;;  %v1777_v11 = vlaneseq }
 0x148   :  { %3855 = vmatpush3.bf16.msra.mxu1 %v4315_v45  ;;  %v5438_v14 = vshrl.u32 %v1777_v11, 7 }
 0x149   :  { %3856 = vmatprep.subr.bf16.mxu1 %v4317_v49 }
 0x14a   :  { %3935 = vmatmul.mubr.msk.bf16.gmra.mxu0 %vm1971_vm1, %v5136_v39  ;;  %v4312_v39 = vld [vmem:[%s6005_s7 + $0x50] sm:$0xff]   ;;  %v1779_v22 = vsub.s32 0, %v5438_v14  ;;  %v1783_v26 = vsub.s32 1, %v5438_v14 }
 0x14b   :  { %3832 = vmatprep.subr.bf16.mxu0 %v4312_v39 }
 0x14c   :  { %3833 = vmatpush3.bf16.msra.mxu0 %v4314_v43  ;;  %3857 = vmatpush3.bf16.msra.mxu1 %v4319_v51  ;;  %v1874_v27 = vrot.slane %v5440_v15, %v1779_v22  ;;  %v1878_v34 = vrot.slane %v5440_v15, %v1783_v26  ;;  %v1780_v37 = vrot.slane %v5465_v33, %v1779_v22 }
 0x14d   :  { %3834 = vmatprep.subr.bf16.mxu0 %v4316_v46  ;;  %3858 = vmatprep.subr.bf16.mxu1 %v4321_v57  ;;  %v1784_v43 = vrot.slane %v5465_v33, %v1783_v26  ;;  %v1827_v51 = vrot.slane %v5469_v38, %v1779_v22 }
 0x150   :  { %3835 = vmatpush3.bf16.msra.mxu0 %v4318_v50  ;;  %3859 = vmatpush3.bf16.msra.mxu1 %v4323_v58  ;;  %v5480_v50 = vadd.f32 %v1780_v37, %v5142_v41 }
 0x151   :  { %3836 = vmatprep.subr.bf16.mxu0 %v4320_v56  ;;  %3860 = vmatprep.subr.bf16.mxu1 %v4324_v3 }
 0x154   :  { %3837 = vmatpush3.bf16.msra.mxu0 %v4322_v44  ;;  %3861 = vmatpush3.bf16.msra.mxu1 %v4326_v5  ;;  %v1831_v44 = vrot.slane %v5469_v38, %v1783_v26 }
 0x155   :  { %3878 = vmatprep.subr.bf16.mxu0 %v4325_v4  ;;  %3862 = vmatprep.subr.bf16.mxu1 %v4328_v6 }
 0x158   :  { %3863 = vmatpush3.bf16.msra.mxu1 %v4330_v7 }
 0x159   :  { %3864 = vmatprep.subr.bf16.mxu1 %v4332_v8 }
 0x15c   :  { %3865 = vmatpush3.bf16.msra.mxu1 %v4334_v9 }
 0x15d   :  { %3951 = vmatprep.subr.bf16.mxu1 %v5429_v10 }
 0x162   :  { %v5389_v52 = vpop.f32.mrf.mxu0  ;;  %v1644_v53 = vpop.f32.mrf.mxu1 }
 0x163   :  { %6012 = vst [vmem:[#allocation4_spill] sm:$0xff] %v5389_v52  ;;  %v5471_v39 = vadd.f32 %v1874_v27, %v1644_v53  ;;  %v5487_v53 = vadd.f32 %v1784_v43, %v5158_v47 }
 0x164   :  { %v5391_v54 = vpop.f32.mrf.mxu0  ;;  %v1646_v55 = vpop.f32.mrf.mxu1 }
 0x165   :  { %6013 = vst [vmem:[#allocation5_spill] sm:$0xff] %v5391_v54  ;;  %v5474_v45 = vadd.f32 %v1878_v34, %v1646_v55 }
 0x166   :  { %v1607_v59 = vpop.f32.mrf.mxu0  ;;  %v1648_v60 = vpop.f32.mrf.mxu1 }
 0x167   :  { %v5494_v59 = vadd.f32 %v1827_v51, %v5224_v0 }
 0x168   :  { %v1608_v1 = vpop.f32.mrf.mxu0  ;;  %v1649_v2 = vpop.f32.mrf.mxu1 }
 0x169   :  { %v5500_v1 = vadd.f32 %v1831_v44, %v5295_v17 }
 0x18a   :  { %v5442_v16 = vpop.f32.mrf.mxu0  ;;  %v5444_v21 = vpop.f32.mrf.mxu1 }
 0x18b   :  { %6015 = vst [vmem:[#allocation7_spill] sm:$0xff] %v5444_v21 }
 0x18c   :  { %v5453_v25 = vpop.f32.mrf.mxu0  ;;  %v5455_v32 = vpop.f32.mrf.mxu1 }
 0x18d   :  { %6016 = vst [vmem:[#allocation8_spill] sm:$0xff] %v5455_v32 }
 0x18e   :  { %v1689_v30 = vpop.f32.mrf.mxu0  ;;  %v1730_v31 = vpop.f32.mrf.mxu1 }
 0x190   :  { %v1690_v35 = vpop.f32.mrf.mxu0  ;;  %v1731_v36 = vpop.f32.mrf.mxu1 }
 0x192   :  { %v2031_v40 = vpop.f32.mrf.mxu1 }
 0x193   :  { %v5477_v46 = vmul.f32 %v2031_v40, %v5471_v39 }
 0x194   :  { %v2033_v49 = vpop.f32.mrf.mxu1 }
 0x195   :  { %v5484_v56 = vmul.f32 %v2033_v49, %v5474_v45 }
 0x196   :  { %v2035_v57 = vpop.f32.mrf.mxu1 }
 0x197   :  { %v5491_v55 = vmul.f32 %v2035_v57, %v5480_v50 }
 0x198   :  { %v2037_v58 = vpop.f32.mrf.mxu1 }
 0x199   :  { %v5497_v41 = vmul.f32 %v2037_v58, %v5487_v53 }
 0x19a   :  { %v2041_v60 = vpop.f32.mrf.mxu1 }
 0x19b   :  { %v5503_v2 = vmul.f32 %v2041_v60, %v5494_v59 }
 0x19c   :  { %v2043_v47 = vpop.f32.mrf.mxu1 }
 0x19d   :  { %v5506_v3 = vmul.f32 %v2043_v47, %v5500_v1 }
 0x19e   :  { %v2045_v4 = vpop.f32.mrf.mxu1 }
 0x19f   :  { %v5509_v5 = vmul.f32 %v2045_v4, %v5471_v39 }
 0x1a0   :  { %v2047_v0 = vpop.f32.mrf.mxu1 }
 0x1a1   :  { %v5512_v6 = vmul.f32 %v2047_v0, %v5474_v45 }
 0x1a2   :  { %v5514_v7 = vpop.f32.mrf.mxu1 }
 0x1a4   :  { %v5516_v8 = vpop.f32.mrf.mxu1 }
 0x1a6   :  { %v5518_v17 = vpop.f32.mrf.mxu1 }
 0x1a8   :  { %v5520_v9 = vpop.f32.mrf.mxu1 }
 0x1aa   :  { %v5522_v11 = vpop.f32.mrf.mxu1 }
 0x1ac   :  { %v5524_v12 = vpop.f32.mrf.mxu1 }
 0x1ae   :  { %v2065_v13 = vpop.f32.mrf.mxu1 }
 0x1b0   :  { %v2066_v22 = vpop.f32.mrf.mxu1 }
 0x1b2   :  { %v5526_v23 = vpop.f32.mrf.mxu0  ;;  %v5528_v24 = vpop.f32.mrf.mxu1 }
 0x1b3   :  { %6017 = vst [vmem:[#allocation9_spill] sm:$0xff] %v5526_v23  ;;  %6018 = vst [vmem:[#allocation10_spill] sm:$0xff] %v5528_v24 }
 0x1b4   :  { %v1769_v26 = vpop.f32.mrf.mxu0  ;;  %v5530_v27 = vpop.f32.mrf.mxu1 }
 0x1b5   :  { %6019 = vst [vmem:[#allocation11_spill] sm:$0xff] %v5530_v27 }
 0x1b6   :  { %v1770_v28 = vpop.f32.mrf.mxu0  ;;  %v5532_v29 = vpop.f32.mrf.mxu1 }
 0x1b7   :  { %6020 = vst [vmem:[#allocation12_spill] sm:$0xff] %v5532_v29 }
 0x1b8   :  { %v1771_v30 = vpop.f32.mrf.mxu0  ;;  %v5534_v31 = vpop.f32.mrf.mxu1 }
 0x1b9   :  { %6021 = vst [vmem:[#allocation13_spill] sm:$0xff] %v5534_v31  ;;  %v5599_v31 = vsub.s32 6, %v5438_v14 }
 0x1ba   :  { %v2021_v34 = vpop.f32.mrf.mxu0  ;;  %v5536_v35 = vpop.f32.mrf.mxu1 }
 0x1bb   :  { %6022 = vst [vmem:[#allocation14_spill] sm:$0xff] %v5536_v35  ;;  %v5595_v35 = vsub.s32 4, %v5438_v14 }
 0x1bc   :  { %v2023_v36 = vpop.f32.mrf.mxu0  ;;  %v5538_v37 = vpop.f32.mrf.mxu1 }
 0x1bd   :  { %6023 = vst [vmem:[#allocation15_spill] sm:$0xff] %v5538_v37  ;;  %v2658_v29 = vmul.f32 %v2023_v36, %v5487_v53  ;;  %v1851_v36 = vrot.slane %v5469_v38, %v5599_v31 }
 0x1be   :  { %v2025_v40 = vpop.f32.mrf.mxu0  ;;  %v5540_v43 = vpop.f32.mrf.mxu1 }
 0x1bf   :  { %6024 = vst [vmem:[#allocation16_spill] sm:$0xff] %v5540_v43  ;;  %v2671_v27 = vmul.f32 %v2025_v40, %v5494_v59 }
 0x1c0   :  { %v2027_v49 = vpop.f32.mrf.mxu0  ;;  %v5542_v51 = vpop.f32.mrf.mxu1 }
 0x1c1   :  { %6025 = vst [vmem:[#allocation17_spill] sm:$0xff] %v5542_v51 }
 0x1c2   :  { %v5544_v57 = vpop.f32.mrf.mxu0  ;;  %v5546_v44 = vpop.f32.mrf.mxu1 }
 0x1c3   :  { %6026 = vst [vmem:[#allocation18_spill] sm:$0xff] %v5546_v44 }
 0x1c4   :  { %v5548_v58 = vpop.f32.mrf.mxu0  ;;  %v5550_v60 = vpop.f32.mrf.mxu1 }
 0x1c5   :  { %6027 = vst [vmem:[#allocation19_spill] sm:$0xff] %v5550_v60 }
 0x1c6   :  { %v5552_v47 = vpop.f32.mrf.mxu0  ;;  %v5554_v4 = vpop.f32.mrf.mxu1 }
 0x1c7   :  { %6028 = vst [vmem:[#allocation20_spill] sm:$0xff] %v5554_v4 }
 0x1c8   :  { %v5556_v0 = vpop.f32.mrf.mxu0  ;;  %v5558_v13 = vpop.f32.mrf.mxu1 }
 0x1c9   :  { %6029 = vst [vmem:[#allocation21_spill] sm:$0xff] %v5558_v13 }
 0x1ca   :  { %v5560_v22 = vpop.f32.mrf.mxu0  ;;  %v5562_v26 = vpop.f32.mrf.mxu1 }
 0x1cb   :  { %6030 = vst [vmem:[#allocation22_spill] sm:$0xff] %v5562_v26 }
 0x1cc   :  { %v5564_v28 = vpop.f32.mrf.mxu0  ;;  %v5566_v30 = vpop.f32.mrf.mxu1 }
 0x1cd   :  { %6031 = vst [vmem:[#allocation23_spill] sm:$0xff] %v5566_v30  ;;  %v5587_v30 = vsub.s32 2, %v5438_v14 }
 0x1ce   :  { %v5568_v23 = vpop.f32.mrf.mxu0  ;;  %v5570_v54 = vpop.f32.mrf.mxu1 }
 0x1cf   :  { %6032 = vst [vmem:[#allocation24_spill] sm:$0xff] %v5570_v54  ;;  %v5590_v54 = vsub.s32 3, %v5438_v14 }
 0x1d0   :  { %v5572_v10 = vpop.f32.mrf.mxu0  ;;  %v5574_v60 = vpop.f32.mrf.mxu1 }
 0x1d1   :  { %6033 = vst [vmem:[#allocation25_spill] sm:$0xff] %v5574_v60  ;;  %v1839_v40 = vrot.slane %v5469_v38, %v5590_v54 }
 0x1d2   :  { %v5576_v4 = vpop.f32.mrf.mxu0  ;;  %v5578_v44 = vpop.f32.mrf.mxu1 }
 0x1d3   :  { %6034 = vst [vmem:[#allocation26_spill] sm:$0xff] %v5578_v44  ;;  %v2657_v44 = vmul.f32 %v2021_v34, %v5480_v50  ;;  %v1792_v34 = vrot.slane %v5465_v33, %v5590_v54 }
 0x1d4   :  { %v5580_v13 = vpop.f32.mrf.mxu0  ;;  %v5582_v51 = vpop.f32.mrf.mxu1 }
 0x1d5   :  { %6035 = vst [vmem:[#allocation27_spill] sm:$0xff] %v5582_v51  ;;  %v5602_v51 = vsub.s32 5, %v5438_v14 }
 0x1d6   :  { %v5584_v26 = vpop.f32.mrf.mxu0  ;;  %v2227_v37 = vpop.f32.mrf.mxu1 }
 0x1d8   :  { %v5592_v43 = vpop.f32.mrf.mxu0  ;;  %v2228_v60 = vpop.f32.mrf.mxu1 }
 0x1d9   :  { %6036 = vst [vmem:[#allocation28_spill] sm:$0xff] %v5592_v43  ;;  %v1788_v60 = vrot.slane %v5465_v33, %v5587_v30  ;;  %v2672_v43 = vmul.f32 %v2027_v49, %v5500_v1  ;;  %v1835_v49 = vrot.slane %v5469_v38, %v5587_v30 }
 0x1da   :  { %v5604_v37 = vpop.f32.mrf.mxu0  ;;  %v2394_v32 = vpop.f32.mrf.mxu1 }
 0x1db   :  { %6037 = vst [vmem:[#allocation29_spill] sm:$0xff] %v5604_v37  ;;  %v2664_v21 = vadd.f32 %v2657_v44, %v2394_v32  ;;  %v5637_v32 = vadd.f32 %v1792_v34, %v5160_v48  ;;  %v1847_v44 = vrot.slane %v5469_v38, %v5602_v51 }
 0x1dc   :  { %v5612_v52 = vpop.f32.mrf.mxu0  ;;  %v2396_v24 = vpop.f32.mrf.mxu1 }
 0x1dd   :  { %6038 = vst [vmem:[#allocation30_spill] sm:$0xff] %v5612_v52  ;;  %v2678_v20 = vadd.f32 %v2671_v27, %v2664_v21  ;;  %v2665_v63 = vadd.f32 %v2658_v29, %v2396_v24  ;;  %v5634_v29 = vadd.f32 %v1788_v60, %v5144_v42  ;;  %v2757_v60 = vmul.f32 %v5516_v8, %v5487_v53 }
 0x1de   :  { %v5625_v52 = vpop.f32.mrf.mxu0  ;;  %v2400_v37 = vpop.f32.mrf.mxu1  ;;  %v2660_v8 = vmul.f32 %v5548_v58, %v5637_v32  ;;  %v2785_v58 = vmul.f32 %v5524_v12, %v5474_v45 }
 0x1df   :  { %6039 = vst [vmem:[#allocation31_spill] sm:$0xff] %v5625_v52  ;;  %v5630_v21 = vadd.f32 %v5477_v46, %v2678_v20  ;;  %v2679_v24 = vadd.f32 %v2672_v43, %v2665_v63  ;;  %v2713_v27 = vadd.f32 %v5491_v55, %v2400_v37  ;;  %v2756_v63 = vmul.f32 %v5514_v7, %v5480_v50 }
 0x1e0   :  { %v5643_v14 = vpop.f32.mrf.mxu0  ;;  %v2402_v52 = vpop.f32.mrf.mxu1  ;;  %v1882_v46 = vrot.slane %v5440_v15, %v5587_v30  ;;  %v1890_v55 = vrot.slane %v5440_v15, %v5595_v35  ;;  %v1886_v50 = vrot.slane %v5440_v15, %v5590_v54  ;;  %v1894_v7 = vrot.slane %v5440_v15, %v5602_v51 }
 0x1e1   :  { %2699 = vst [vmem:[%s6007_s8] sm:$0xff] %v5630_v21  ;;  %v2693_v42 = vadd.f32 %v5484_v56, %v2679_v24  ;;  %v2727_v48 = vadd.f32 %v5503_v2, %v2713_v27  ;;  %v2714_v20 = vadd.f32 %v5497_v41, %v2402_v52  ;;  %v2770_v56 = vmul.f32 %v5518_v17, %v5494_v59 }
 0x1e2   :  { %v5662_v43 = vpop.f32.mrf.mxu0  ;;  %v2406_v37 = vpop.f32.mrf.mxu1  ;;  %v5672_v54 = vadd.f32 %v1839_v40, %v5297_v18  ;;  %v5675_v30 = vadd.f32 %v1835_v49, %v5306_v19  ;;  %v2784_v59 = vmul.f32 %v5522_v11, %v5471_v39  ;;  %v5691_v53 = vadd.f32 %v1882_v46, %v5442_v16 }
 0x1e3   :  { %2700 = vst [vmem:[%s6007_s8 + $0x8] sm:$0xff] %v2693_v42  ;;  %v2741_v52 = vadd.f32 %v5509_v5, %v2727_v48  ;;  %v2728_v41 = vadd.f32 %v5506_v3, %v2714_v20  ;;  %v2763_v2 = vadd.f32 %v2756_v63, %v2406_v37  ;;  %v2659_v5 = vmul.f32 %v5544_v57, %v5634_v29 }
 0x1e4   :  { %v5681_v17 = vpop.f32.mrf.mxu0  ;;  %v2408_v34 = vpop.f32.mrf.mxu1  ;;  %v2771_v39 = vmul.f32 %v5520_v9, %v5500_v1  ;;  %v2673_v49 = vmul.f32 %v5552_v47, %v5675_v30  ;;  %v4327_v1 = vld [vmem:[%s6005_s7 + $0x138] sm:$0xff]   ;;  %v5708_v9 = vadd.f32 %v1886_v50, %v5453_v25  ;;  %v2674_v47 = vmul.f32 %v5556_v0, %v5672_v54 }
 0x1e5   :  { %3739 = vst [vmem:[%s6007_s8 + $0x38] sm:$0xff] %v2741_v52  ;;  %v2806_v18 = vpack.c.bf16 %v2741_v52, %v5630_v21  ;;  %v2742_v19 = vadd.f32 %v5512_v6, %v2728_v41  ;;  %v2777_v3 = vadd.f32 %v2770_v56, %v2763_v2  ;;  %v2764_v11 = vadd.f32 %v2757_v60, %v2408_v34 }
 0x1e6   :  { %v2146_v57 = vpop.f32.mrf.mxu0  ;;  %v2477_v40 = vpop.f32.mrf.mxu1  ;;  %v2687_v48 = vmul.f32 %v5560_v22, %v5691_v53  ;;  %v2708_v25 = vmul.f32 %v5568_v23, %v5634_v29  ;;  %v6040_v0 = vrot.slane %v5465_v33, %v5595_v35  ;;  %v2688_v22 = vmul.f32 %v5564_v28, %v5708_v9 }
 0x1e7   :  { %3740 = vst [vmem:[%s6007_s8 + $0x40] sm:$0xff] %v2742_v19  ;;  %v5702_v6 = vadd.f32 %v2784_v59, %v2777_v3  ;;  %v2666_v16 = vadd.f32 %v2659_v5, %v2477_v40  ;;  %v2807_v21 = vpack.c.bf16 %v2742_v19, %v2693_v42  ;;  %v2778_v24 = vadd.f32 %v2771_v39, %v2764_v11  ;;  %v4329_v42 = vld [vmem:[%s6005_s7 + $0x170] sm:$0xff]   ;;  %v6043_v39 = vld [vmem:[#allocation2_spill] sm:$0xff]  ;;  %v6045_v57 = vld [vmem:[#allocation3_spill] sm:$0xff] }
 0x1e8   :  { %v2147_v27 = vpop.f32.mrf.mxu0  ;;  %v2479_v63 = vpop.f32.mrf.mxu1  ;;  %v5729_v20 = vadd.f32 %v6040_v0, %v5212_v61  ;;  %v2709_v23 = vmul.f32 %v5572_v10, %v5637_v32  ;;  %v2722_v56 = vmul.f32 %v5576_v4, %v5675_v30  ;;  %v4331_v61 = vld [vmem:[%s6005_s7 + $0x130] sm:$0xff]   ;;  %v6041_v10 = vrot.slane %v5465_v33, %v5599_v31 }
 0x1e9   :  { %3746 = vst [vmem:[%s6007_s8 + $0x70] sm:$0xff] %v5702_v6  ;;  %v2680_v45 = vadd.f32 %v2673_v49, %v2666_v16  ;;  %v2667_v12 = vadd.f32 %v2660_v8, %v2479_v63  ;;  %3300 = vmatprep.mubr.bf16.mxu0 %v2807_v21  ;;  %v2792_v46 = vadd.f32 %v2785_v58, %v2778_v24  ;;  %v6048_v21 = vld [vmem:[#allocation30_spill] sm:$0xff] }
 0x1ea   :  { %v5735_v50 = vpop.f32.mrf.mxu0  ;;  %v2483_v37 = vpop.f32.mrf.mxu1  ;;  %3301 = vmatmul.mubr.bf16.vlgmr.msra.gmra.mxu0 %v2806_v18  ;;  %v5748_v28 = vadd.f32 %v6041_v10, %v5214_v62  ;;  %v2723_v60 = vmul.f32 %v5580_v13, %v5672_v54  ;;  %v2736_v4 = vmul.f32 %v5584_v26, %v5691_v53  ;;  %v4333_v18 = vld [vmem:[%s6005_s7 + $0x168] sm:$0xff]   ;;  %v6042_v62 = vld [vmem:[#allocation29_spill] sm:$0xff]  ;;  %v6044_v8 = vrot.slane %v5465_v33, %v5602_v51 }
 0x1eb   :  { %v5739_v52 = vadd.f32 %v2687_v48, %v2680_v45  ;;  %v2681_v41 = vadd.f32 %v2674_v47, %v2667_v12  ;;  %v2715_v2 = vadd.f32 %v2708_v25, %v2483_v37  ;;  %3879 = vmatpush3.bf16.msra.mxu0 %v4327_v1  ;;  %3747 = vst [vmem:[%s6007_s8 + $0x78] sm:$0xff] %v2792_v46  ;;  %v6049_v33 = vld [vmem:[#allocation31_spill] sm:$0xff] }
 0x1ec   :  { %v3920_v59 = vpop.f32.mrf.mxu0  ;;  %v2485_v34 = vpop.f32.mrf.mxu1  ;;  %v2814_v5 = vpack.c.bf16 %v2792_v46, %v2792_v46  ;;  %3880 = vmatprep.subr.bf16.mxu0 %v4329_v42  ;;  %v2758_v19 = vmul.f32 %v6042_v62, %v5634_v29  ;;  %v5770_v11 = vadd.f32 %v6044_v8, %v6043_v39  ;;  %v6046_v40 = vrot.slane %v5469_v38, %v5595_v35  ;;  %v6047_v29 = vld [vmem:[#allocation28_spill] sm:$0xff]  ;;  %v4335_v48 = vld [vmem:[%s6005_s7 + $0x128] sm:$0xff]   ;;  %v6070_v38 = vld [vmem:[#allocation25_spill] sm:$0xff] }
 0x1ed   :  { %2701 = vst [vmem:[%s6007_s8 + $0x10] sm:$0xff] %v5739_v52  ;;  %v2695_v13 = vadd.f32 %v2688_v22, %v2681_v41  ;;  %v2729_v26 = vadd.f32 %v2722_v56, %v2715_v2  ;;  %v2716_v3 = vadd.f32 %v2709_v23, %v2485_v34  ;;  %v2737_v16 = vmul.f32 %v6047_v29, %v5708_v9  ;;  %v4336_v23 = vld [vmem:[%s6005_s7 + $0x160] sm:$0xff]   ;;  %v6053_v41 = vld [vmem:[#allocation11_spill] sm:$0xff]  ;;  %v6055_v59 = vld [vmem:[#allocation8_spill] sm:$0xff] }
 0x1ee   :  { %v5776_v49 = vadd.f32 %v6046_v40, %v6045_v57  ;;  %v2759_v1 = vmul.f32 %v6048_v21, %v5637_v32  ;;  %3308 = vmatprep.mubr.bf16.mxu0 %v2814_v5  ;;  %v5782_v58 = vpop.f32.mrf.mxu0  ;;  %v2489_v47 = vpop.f32.mrf.mxu1  ;;  %v2772_v24 = vmul.f32 %v6049_v33, %v5675_v30  ;;  %v6050_v32 = vld [vmem:[#allocation10_spill] sm:$0xff]  ;;  %v2773_v45 = vmul.f32 %v5643_v14, %v5672_v54  ;;  %v6056_v5 = vld [vmem:[#allocation13_spill] sm:$0xff]  ;;  %v6058_v39 = vld [vmem:[#allocation16_spill] sm:$0xff] }
 0x1ef   :  { %2702 = vst [vmem:[%s6007_s8 + $0x18] sm:$0xff] %v2695_v13  ;;  %v2743_v27 = vadd.f32 %v2736_v4, %v2729_v26  ;;  %v2730_v63 = vadd.f32 %v2723_v60, %v2716_v3  ;;  %v2765_v42 = vadd.f32 %v2758_v19, %v2489_v47  ;;  %3881 = vmatpush3.bf16.msra.mxu0 %v4331_v61  ;;  %v4338_v3 = vld [vmem:[%s6005_s7 + $0x120] sm:$0xff]   ;;  %v4340_v40 = vld [vmem:[%s6005_s7 + $0x1b0] sm:$0xff]  }
 0x1f0   :  { %v2661_v25 = vmul.f32 %v6050_v32, %v5729_v20  ;;  %v2786_v30 = vmul.f32 %v5662_v43, %v5691_v53  ;;  %v3921_v12 = vpop.f32.mrf.mxu0  ;;  %v2491_v0 = vpop.f32.mrf.mxu1  ;;  %3882 = vmatprep.subr.bf16.mxu0 %v4333_v18  ;;  %v2813_v22 = vpack.c.bf16 %v5702_v6, %v5702_v6  ;;  %v6051_v43 = vld [vmem:[#allocation4_spill] sm:$0xff]  ;;  %v6052_v6 = vld [vmem:[#allocation7_spill] sm:$0xff]  ;;  %v2662_v2 = vmul.f32 %v6053_v41, %v5770_v11  ;;  %v6061_v33 = vld [vmem:[#allocation18_spill] sm:$0xff] }
 0x1f1   :  { %3741 = vst [vmem:[%s6007_s8 + $0x48] sm:$0xff] %v2743_v27  ;;  %v2808_v46 = vpack.c.bf16 %v2743_v27, %v5739_v52  ;;  %v2744_v14 = vadd.f32 %v2737_v16, %v2730_v63  ;;  %v2779_v54 = vadd.f32 %v2772_v24, %v2765_v42  ;;  %v2766_v37 = vadd.f32 %v2759_v1, %v2491_v0  ;;  %v6054_v52 = vld [vmem:[#allocation12_spill] sm:$0xff]  ;;  %v6059_v16 = vld [vmem:[#allocation15_spill] sm:$0xff]  ;;  %v6060_v1 = vld [vmem:[#allocation17_spill] sm:$0xff] }
 0x1f2   :  { %v5811_v53 = vadd.f32 %v1847_v44, %v6051_v43  ;;  %v5817_v56 = vadd.f32 %v1890_v55, %v6052_v6  ;;  %v2675_v61 = vmul.f32 %v6054_v52, %v5776_v49  ;;  %v5823_v10 = vpop.f32.mrf.mxu0  ;;  %v2560_v60 = vpop.f32.mrf.mxu1  ;;  %3309 = vmatmul.mubr.bf16.gmra.mxu0 %v2813_v22  ;;  %v2787_v44 = vmul.f32 %v5681_v17, %v5708_v9  ;;  %v6057_v17 = vld [vmem:[#allocation14_spill] sm:$0xff]  ;;  %v6062_v42 = vld [vmem:[#allocation19_spill] sm:$0xff]  ;;  %v6066_v41 = vld [vmem:[#allocation5_spill] sm:$0xff] }
 0x1f3   :  { %3742 = vst [vmem:[%s6007_s8 + $0x50] sm:$0xff] %v2744_v14  ;;  %v5830_v35 = vadd.f32 %v2786_v30, %v2779_v54  ;;  %v2780_v55 = vadd.f32 %v2773_v45, %v2766_v37  ;;  %v2668_v4 = vadd.f32 %v2661_v25, %v2560_v60  ;;  %3883 = vmatpush3.bf16.msra.mxu0 %v4335_v48  ;;  %v6063_v45 = vld [vmem:[#allocation20_spill] sm:$0xff]  ;;  %v6064_v12 = vld [vmem:[#allocation22_spill] sm:$0xff]  ;;  %v4341_v37 = vld [vmem:[%s6005_s7 + $0x118] sm:$0xff]  }
 0x1f4   :  { %v5836_v34 = vadd.f32 %v1894_v7, %v6055_v59  ;;  %v2676_v18 = vmul.f32 %v6056_v5, %v5811_v53  ;;  %v2689_v9 = vmul.f32 %v6057_v17, %v5817_v56  ;;  %v3924_v62 = vpop.f32.mrf.mxu0  ;;  %v2562_v19 = vpop.f32.mrf.mxu1  ;;  %v2809_v26 = vpack.c.bf16 %v2744_v14, %v2695_v13  ;;  %3884 = vmatprep.subr.bf16.mxu0 %v4336_v23  ;;  %v4339_v13 = vld [vmem:[%s6005_s7 + $0x158] sm:$0xff]   ;;  %v6065_v22 = vld [vmem:[#allocation6_spill] sm:$0xff]  ;;  %v6068_v60 = vld [vmem:[#allocation23_spill] sm:$0xff] }
 0x1f5   :  { %v2710_v8 = vmul.f32 %v6058_v39, %v5729_v20  ;;  %3748 = vst [vmem:[%s6007_s8 + $0x80] sm:$0xff] %v5830_v35  ;;  %v2794_v51 = vadd.f32 %v2787_v44, %v2780_v55  ;;  %v2682_v7 = vadd.f32 %v2675_v61, %v2668_v4  ;;  %v2669_v57 = vadd.f32 %v2662_v2, %v2562_v19  ;;  %v6067_v52 = vld [vmem:[#allocation21_spill] sm:$0xff]  ;;  %v6069_v55 = vld [vmem:[#allocation24_spill] sm:$0xff] }
 0x1f6   :  { %v1898_v29 = vrot.slane %v5440_v15, %v5599_v31  ;;  %v2690_v21 = vmul.f32 %v6059_v16, %v5836_v34  ;;  %v2711_v47 = vmul.f32 %v6060_v1, %v5770_v11  ;;  %v2724_v24 = vmul.f32 %v6061_v33, %v5776_v49  ;;  %3348 = vmatprep.mubr.bf16.mxu1 %v2809_v26  ;;  %v5865_v27 = vpop.f32.mrf.mxu0  ;;  %v2566_v63 = vpop.f32.mrf.mxu1 }
 0x1f7   :  { %v2725_v48 = vmul.f32 %v6062_v42, %v5811_v53  ;;  %3749 = vst [vmem:[%s6007_s8 + $0x88] sm:$0xff] %v2794_v51  ;;  %v5872_v15 = vadd.f32 %v2689_v9, %v2682_v7  ;;  %v2683_v32 = vadd.f32 %v2676_v18, %v2669_v57  ;;  %v2717_v25 = vadd.f32 %v2710_v8, %v2566_v63  ;;  %v4343_v18 = vld [vmem:[%s6005_s7 + $0x1a8] sm:$0xff]   ;;  %v6072_v7 = vld [vmem:[#allocation9_spill] sm:$0xff] }
 0x1f8   :  { %3349 = vmatmul.mubr.bf16.vlgmr.msra.gmra.mxu1 %v2808_v46  ;;  %v2738_v30 = vmul.f32 %v6063_v45, %v5817_v56  ;;  %v2760_v0 = vmul.f32 %v6064_v12, %v5729_v20  ;;  %3885 = vmatpush3.bf16.msra.mxu0 %v4338_v3  ;;  %v3925_v23 = vpop.f32.mrf.mxu0  ;;  %v2568_v14 = vpop.f32.mrf.mxu1  ;;  %v2816_v54 = vpack.c.bf16 %v2794_v51, %v2794_v51  ;;  %v4342_v20 = vld [vmem:[%s6005_s7 + $0x150] sm:$0xff]   ;;  %v4346_v51 = vld [vmem:[%s6005_s7 + $0x1a0] sm:$0xff]   ;;  %v4349_v45 = vld [vmem:[%s6005_s7 + $0x198] sm:$0xff]  }
 0x1f9   :  { %3952 = vmatpush3.bf16.msra.mxu1 %v6065_v22  ;;  %2703 = vst [vmem:[%s6007_s8 + $0x20] sm:$0xff] %v5872_v15  ;;  %v2697_v46 = vadd.f32 %v2690_v21, %v2683_v32  ;;  %v2731_v43 = vadd.f32 %v2724_v24, %v2717_v25  ;;  %v2718_v6 = vadd.f32 %v2711_v47, %v2568_v14  ;;  %v4344_v3 = vld [vmem:[%s6005_s7 + $0x110] sm:$0xff]  }
 0x1fa   :  { %3886 = vmatprep.subr.bf16.mxu0 %v4339_v13  ;;  %3953 = vmatprep.subr.bf16.mxu1 %v4340_v40  ;;  %v5893_v2 = vadd.f32 %v1851_v36, %v6066_v41  ;;  %v2739_v61 = vmul.f32 %v6067_v52, %v5836_v34  ;;  %v2761_v44 = vmul.f32 %v6068_v60, %v5770_v11  ;;  %v2280_v59 = vpop.f32.mrf.mxu0  ;;  %v2572_v5 = vpop.f32.mrf.mxu1  ;;  %v6073_v13 = vld [vmem:[#allocation27_spill] sm:$0xff] }
 0x1fb   :  { %v2774_v4 = vmul.f32 %v6069_v55, %v5776_v49  ;;  %3356 = vmatprep.mubr.bf16.mxu1 %v2816_v54  ;;  %v2775_v31 = vmul.f32 %v6070_v38, %v5811_v53  ;;  %2704 = vst [vmem:[%s6007_s8 + $0x28] sm:$0xff] %v2697_v46  ;;  %v5909_v36 = vadd.f32 %v2738_v30, %v2731_v43  ;;  %v6071_v49 = vld [vmem:[#allocation26_spill] sm:$0xff] }
 0x1fc   :  { %v2732_v11 = vadd.f32 %v2725_v48, %v2718_v6  ;;  %v2767_v17 = vadd.f32 %v2760_v0, %v2572_v5  ;;  %v2788_v9 = vmul.f32 %v6071_v49, %v5817_v56  ;;  %v2663_v62 = vmul.f32 %v5735_v50, %v5748_v28  ;;  %3887 = vmatpush3.bf16.msra.mxu0 %v4341_v37  ;;  %v3928_v19 = vpop.f32.mrf.mxu0  ;;  %v2574_v26 = vpop.f32.mrf.mxu1  ;;  %v4350_v54 = vld [vmem:[%s6005_s7 + $0x100] sm:$0xff]   ;;  %v4351_v6 = vld [vmem:[%s6005_s7 + $0x190] sm:$0xff]  }
 0x1fd   :  { %3954 = vmatpush3.bf16.msra.mxu1 %v4340_v40  ;;  %v2815_v53 = vpack.c.bf16 %v5830_v35, %v5830_v35  ;;  %3743 = vst [vmem:[%s6007_s8 + $0x58] sm:$0xff] %v5909_v36  ;;  %v2810_v56 = vpack.c.bf16 %v5909_v36, %v5872_v15  ;;  %v2768_v8 = vadd.f32 %v2761_v44, %v2574_v26  ;;  %v4345_v35 = vld [vmem:[%s6005_s7 + $0x148] sm:$0xff]  }
 0x1fe   :  { %v2746_v50 = vadd.f32 %v2739_v61, %v2732_v11  ;;  %v2781_v39 = vadd.f32 %v2774_v4, %v2767_v17  ;;  %3888 = vmatprep.subr.bf16.mxu0 %v4342_v20  ;;  %v1912_v57 = vadd.f32 %v1898_v29, %v6072_v7  ;;  %v2789_v40 = vmul.f32 %v6073_v13, %v5836_v34  ;;  %v2283_v16 = vpop.f32.mrf.mxu0  ;;  %v2643_v21 = vpop.f32.mrf.mxu1  ;;  %v4353_v11 = vld [vmem:[%s6005_s7 + $0x180] sm:$0xff]  }
 0x1ff   :  { %3955 = vmatprep.subr.bf16.mxu1 %v4343_v18  ;;  %v2677_v1 = vmul.f32 %v5782_v58, %v5893_v2  ;;  %v2782_v33 = vadd.f32 %v2775_v31, %v2768_v8  ;;  %v2670_v24 = vadd.f32 %v2663_v62, %v2643_v21  ;;  %v4347_v58 = vld [vmem:[%s6005_s7 + $0x108] sm:$0xff]   ;;  %v2712_v48 = vmul.f32 %v5865_v27, %v5748_v28 }
 0x200   :  { %3744 = vst [vmem:[%s6007_s8 + $0x60] sm:$0xff] %v2746_v50  ;;  %v5940_v47 = vadd.f32 %v2788_v9, %v2781_v39  ;;  %3357 = vmatmul.mubr.bf16.gmra.mxu1 %v2815_v53  ;;  %v2691_v29 = vmul.f32 %v5823_v10, %v1912_v57  ;;  %3889 = vmatpush3.bf16.msra.mxu0 %v4344_v3  ;;  %v3929_v34 = vpop.f32.mrf.mxu0  ;;  %v3944_v63 = vpop.f32.mrf.mxu1  ;;  %v4348_v10 = vld [vmem:[%s6005_s7 + $0x140] sm:$0xff]  }
 0x201   :  { %3956 = vmatpush3.bf16.msra.mxu1 %v4343_v18  ;;  %v2811_v42 = vpack.c.bf16 %v2746_v50, %v2697_v46  ;;  %v2796_v32 = vadd.f32 %v2789_v40, %v2782_v33  ;;  %v2684_v25 = vadd.f32 %v2677_v1, %v2670_v24  ;;  %3890 = vmatprep.subr.bf16.mxu0 %v4345_v35 }
 0x202   :  { %3750 = vst [vmem:[%s6007_s8 + $0x90] sm:$0xff] %v5940_v47  ;;  %3957 = vmatprep.subr.bf16.mxu1 %v4346_v51  ;;  %v2288_v30 = vpop.f32.mrf.mxu0  ;;  %v2648_v27 = vpop.f32.mrf.mxu1  ;;  %v2726_v12 = vmul.f32 %v2280_v59, %v5893_v2  ;;  %v2740_v37 = vmul.f32 %v2283_v16, %v1912_v57  ;;  %v4352_v59 = vld [vmem:[%s6005_s7 + $0x188] sm:$0xff]   ;;  %v2817_v15 = vpack.c.bf16 %v5940_v47, %v5940_v47 }
 0x203   :  { %3396 = vmatprep.mubr.bf16.mxu0 %v2811_v42  ;;  %3751 = vst [vmem:[%s6007_s8 + $0x98] sm:$0xff] %v2796_v32  ;;  %v2698_v0 = vadd.f32 %v2691_v29, %v2684_v25  ;;  %v2719_v22 = vadd.f32 %v2712_v48, %v2648_v27  ;;  %v2762_v46 = vmul.f32 %v2288_v30, %v5748_v28 }
 0x204   :  { %3891 = vmatpush3.bf16.msra.mxu0 %v4347_v58  ;;  %v3932_v23 = vpop.f32.mrf.mxu0  ;;  %v3947_v14 = vpop.f32.mrf.mxu1  ;;  %v2818_v18 = vpack.c.bf16 %v2796_v32, %v2796_v32 }
 0x205   :  { %3958 = vmatpush3.bf16.msra.mxu1 %v4346_v51  ;;  %2705 = vst [vmem:[%s6007_s8 + $0x30] sm:$0xff] %v2698_v0  ;;  %v2733_v43 = vadd.f32 %v2726_v12, %v2719_v22  ;;  %3892 = vmatprep.subr.bf16.mxu0 %v4348_v10 }
 0x206   :  { %3959 = vmatprep.subr.bf16.mxu1 %v4349_v45  ;;  %v2291_v20 = vpop.f32.mrf.mxu0  ;;  %v2653_v41 = vpop.f32.mrf.mxu1 }
 0x207   :  { %v2747_v52 = vadd.f32 %v2740_v37, %v2733_v43  ;;  %v2776_v61 = vmul.f32 %v2291_v20, %v5893_v2  ;;  %v2769_v60 = vadd.f32 %v2762_v46, %v2653_v41 }
 0x208   :  { %3893 = vmatpush3.bf16.msra.mxu0 %v4350_v54  ;;  %v3933_v44 = vpop.f32.mrf.mxu0  ;;  %v3950_v55 = vpop.f32.mrf.mxu1 }
 0x209   :  { %3960 = vmatpush3.bf16.msra.mxu1 %v4349_v45  ;;  %3745 = vst [vmem:[%s6007_s8 + $0x68] sm:$0xff] %v2747_v52  ;;  %v2783_v28 = vadd.f32 %v2776_v61, %v2769_v60  ;;  %v2812_v4 = vpack.c.bf16 %v2747_v52, %v2698_v0 }
 0x20a   :  { %3961 = vmatprep.subr.bf16.mxu1 %v4351_v6  ;;  %v2296_v5 = vpop.f32.mrf.mxu0 }
 0x20b   :  { %3397 = vmatmul.mubr.bf16.vlgmr.msra.gmra.mxu0 %v2810_v56  ;;  %v2790_v2 = vmul.f32 %v2296_v5, %v1912_v57  ;;  %3967 = vmatprep.mubr.bf16.mxu1 %v2812_v4 }
 0x20c   :  { %3404 = vmatprep.mubr.bf16.mxu0 %v2818_v18  ;;  %v3936_v38 = vpop.f32.mrf.mxu0 }
 0x20d   :  { %3962 = vmatpush3.bf16.msra.mxu1 %v4351_v6  ;;  %v2797_v31 = vadd.f32 %v2790_v2, %v2783_v28 }
 0x20e   :  { %3963 = vmatprep.subr.bf16.mxu1 %v4352_v59  ;;  %v2299_v17 = vpop.f32.mrf.mxu0 }
 0x20f   :  { %3752 = vst [vmem:[%s6007_s8 + $0xa0] sm:$0xff] %v2797_v31  ;;  %v2819_v36 = vpack.c.bf16 %v2797_v31, %v2797_v31 }
 0x210   :  { %v3937_v49 = vpop.f32.mrf.mxu0 }
 0x211   :  { %3964 = vmatpush3.bf16.msra.mxu1 %v4352_v59 }
 0x212   :  { %3965 = vmatprep.subr.bf16.mxu1 %v4353_v11 }
 0x213   :  { %3405 = vmatmul.mubr.bf16.gmra.mxu0 %v2817_v15 }
 0x215   :  { %3966 = vmatpush3.bf16.msra.mxu1 %v4353_v11 }
 0x218   :  { %3968 = vmatmul.mubr.bf16.vlgmr.msra.gmra.mxu1 %v2819_v36 }
 0x2aa   :  { %v3838_v9 = vpop.f32.mrf.mxu0 }
 0x2ac   :  { %v3839_v62 = vpop.f32.mrf.mxu0 }
 0x2ad   :  { %v3840_v34 = vadd.f32 %v3839_v62, %v3838_v9 }
 0x2ae   :  { %v3841_v19 = vpop.f32.mrf.mxu0 }
 0x2b0   :  { %v3842_v26 = vpop.f32.mrf.mxu0 }
 0x2b1   :  { %v3843_v27 = vadd.f32 %v3842_v26, %v3841_v19 }
 0x2b2   :  { %v3844_v53 = vpop.f32.mrf.mxu0 }
 0x2b4   :  { %v3845_v3 = vpop.f32.mrf.mxu0 }
 0x2b5   :  { %v3846_v63 = vadd.f32 %v3845_v3, %v3844_v53 }
 0x2b6   :  { %v3847_v56 = vpop.f32.mrf.mxu0 }
 0x2b8   :  { %v3866_v50 = vpop.f32.mrf.mxu1  ;;  %v3848_v39 = vpop.f32.mrf.mxu0 }
 0x2ba   :  { %v3867_v8 = vpop.f32.mrf.mxu1 }
 0x2bb   :  { %v3868_v33 = vadd.f32 %v3867_v8, %v3866_v50 }
 0x2bc   :  { %v3869_v35 = vpop.f32.mrf.mxu1 }
 0x2bd   :  { %v3351_v48 = vadd.f32 %v3868_v33, %v3840_v34 }
 0x2be   :  { %v3870_v51 = vpop.f32.mrf.mxu1 }
 0x2bf   :  { %v3871_v32 = vadd.f32 %v3870_v51, %v3869_v35 }
 0x2c0   :  { %v3872_v7 = vpop.f32.mrf.mxu1 }
 0x2c1   :  { %v3354_v54 = vadd.f32 %v3871_v32, %v3843_v27 }
 0x2c2   :  { %v3873_v57 = vpop.f32.mrf.mxu1 }
 0x2c3   :  { %v3874_v24 = vadd.f32 %v3873_v57, %v3872_v7 }
 0x2c4   :  { %v3875_v13 = vpop.f32.mrf.mxu1 }
 0x2c5   :  { %v3359_v25 = vadd.f32 %v3874_v24, %v3846_v63 }
 0x2c6   :  { %v3876_v40 = vpop.f32.mrf.mxu1 }
 0x2cb   :  { %v3894_v16 = vpop.f32.mrf.mxu0 }
 0x2cd   :  { %v3895_v21 = vpop.f32.mrf.mxu0 }
 0x2ce   :  { %v3896_v42 = vadd.f32 %v3895_v21, %v3894_v16 }
 0x2cf   :  { %v3897_v1 = vpop.f32.mrf.mxu0 }
 0x2d0   :  { %v3399_v22 = vadd.f32 %v3896_v42, %v3351_v48 }
 0x2d1   :  { %v3898_v47 = vpop.f32.mrf.mxu0 }
 0x2d2   :  { %v3899_v12 = vadd.f32 %v3898_v47, %v3897_v1 }
 0x2d3   :  { %v3900_v29 = vpop.f32.mrf.mxu0 }
 0x2d4   :  { %v3402_v6 = vadd.f32 %v3899_v12, %v3354_v54 }
 0x2d5   :  { %v3901_v58 = vpop.f32.mrf.mxu0 }
 0x2d6   :  { %v3902_v10 = vadd.f32 %v3901_v58, %v3900_v29 }
 0x2d7   :  { %v3903_v45 = vpop.f32.mrf.mxu0 }
 0x2d8   :  { %v3969_v30 = vpop.f32.mrf.mxu1  ;;  %v3407_v0 = vadd.f32 %v3902_v10, %v3359_v25 }
 0x2d9   :  { %v3904_v23 = vpop.f32.mrf.mxu0 }
 0x2da   :  { %v3446_v14 = vpop.f32.mrf.mxu1  ;;  %v3455_v37 = vadd.f32 %v3969_v30, %v3407_v0 }
 0x2db   :  { %v3447_v46 = vadd.f32 %v3446_v14, %v3399_v22 }
 0x2dc   :  { %v3970_v43 = vpop.f32.mrf.mxu1  ;;  %3810 = vst [vmem:[%s6008_s9 + $0x10] sm:$0xff] %v3455_v37 }
 0x2dd   :  { %3460 = vst [vmem:[%s6008_s9] sm:$0xff] %v3447_v46 }
 0x2de   :  { %v3449_v20 = vpop.f32.mrf.mxu1 }
 0x2df   :  { %v3450_v41 = vadd.f32 %v3449_v20, %v3402_v6 }
 0x2e1   :  { %3809 = vst [vmem:[%s6008_s9 + $0x8] sm:$0xff] %v3450_v41 }

</bundles_post_ra>
